<compile_context>
chip_gen: v6e
topology: v6e:2x2x1
jax: 0.10.0
libtpu: 0.0.40
codegen_flags: <defaults>
</compile_context>

<pallas_src>
import math
import numpy as np
import jax
import jax.numpy as jnp
from jax.experimental import pallas as pl
from jax.experimental.pallas import tpu as pltpu

# ---- synthetic stand-in for config.Config() ----
NUM_CHN = 4            # cfg.num_chn
NUM_CNN_LAYERS = 3     # cfg.num_cnn_layers
NUM_CNN_KERNELS = 32   # cfg.num_cnn_kernels
KERNEL_SIZE = 3        # cfg.kernel_size
WIN_LEN = 256          # int(cfg.win_len * cfg.samp_rate)
OUT_CHANNELS = WIN_LEN // 2 ** (NUM_CNN_LAYERS + 1)   # AdaptiveAvgPool1d target length
BN_EPS = 1e-5
BATCH = 2


# ---------------- static helper matrix (built host-side) ----------------
def adaptive_avg_matrix(l_in, l_out):
    """(l_out, l_in) matrix reproducing torch AdaptiveAvgPool1d segment averages."""
    m = np.zeros((l_out, l_in), np.float32)
    for i in range(l_out):
        s = (i * l_in) // l_out
        e = math.ceil((i + 1) * l_in / l_out)
        m[i, s:e] = 1.0 / (e - s)
    return m


# ---------------- Pallas kernel (one batch element per grid step) ----------------
def detnet_kernel(x_ref,
                  w1_ref, s1_ref, b1_ref,
                  w2_ref, s2_ref, b2_ref,
                  w3_ref, s3_ref, b3_ref,
                  a_ref, bfc_ref,
                  out_ref, y_scr):
    h = x_ref[0]                                               # (L, Cin) f32
    for w_ref, s_ref, b_ref in ((w1_ref, s1_ref, b1_ref),
                                (w2_ref, s2_ref, b2_ref),
                                (w3_ref, s3_ref, b3_ref)):
        l_out = h.shape[0] - KERNEL_SIZE + 1
        # im2col: single (L_out, K*Cin) @ (K*Cin, Cout) bf16 matmul per layer
        cols = jnp.concatenate(
            [h[k:k + l_out, :] for k in range(KERNEL_SIZE)], axis=1)
        acc = jnp.dot(cols.astype(jnp.bfloat16), w_ref[...],
                      preferred_element_type=jnp.float32)       # (L_out, Cout) f32
        # folded conv-bias + eval-mode BatchNorm + ReLU
        y = jnp.maximum(acc * s_ref[...] + b_ref[...], 0.0)
        # MaxPool1d(2): stage in VMEM scratch, sublane-strided even/odd max
        l_pool = l_out // 2
        y_scr[pl.ds(0, l_out), :] = y
        h = jnp.maximum(y_scr[pl.ds(0, l_pool, stride=2), :],
                        y_scr[pl.ds(1, l_pool, stride=2), :])    # (L_pool, Cout)
    # AdaptiveAvgPool1d + Linear folded host-side into A (2, L_final, Cout):
    #   logit_j = sum(h * A[j]) + bfc[j]
    outs = []
    for j in range(2):
        t = jnp.sum(h * a_ref[j], axis=1, keepdims=True)         # (L_final, 1)
        outs.append(jnp.sum(t, axis=0, keepdims=True))           # (1, 1)
    out_ref[0] = jnp.concatenate(outs, axis=1) + bfc_ref[...]    # (1, 2)


# ---------------- wrapper ----------------
def detnet_forward(x_ncl, kp):
    n = x_ncl.shape[0]
    x_nlc = jnp.transpose(x_ncl, (0, 2, 1)).astype(jnp.float32)   # (N, L, Cin)
    params = [kp["w1"], kp["s1"], kp["b1"],
              kp["w2"], kp["s2"], kp["b2"],
              kp["w3"], kp["s3"], kp["b3"],
              kp["A"], kp["bfc"]]

    in_specs = [pl.BlockSpec((1, WIN_LEN, NUM_CHN), lambda i: (i, 0, 0))]
    for p in params:
        in_specs.append(
            pl.BlockSpec(p.shape, lambda i, nd=p.ndim: (0,) * nd))

    out = pl.pallas_call(
        detnet_kernel,
        out_shape=jax.ShapeDtypeStruct((n, 1, 2), jnp.float32),
        grid=(n,),
        in_specs=in_specs,
        out_specs=pl.BlockSpec((1, 1, 2), lambda i: (i, 0, 0)),
        scratch_shapes=[pltpu.VMEM((WIN_LEN, NUM_CNN_KERNELS), jnp.float32)],
        compiler_params=pltpu.CompilerParams(
            dimension_semantics=("parallel",)),
    )(x_nlc, *params)
    return out.reshape(n, 2)


# ---------------- deterministic parameter init ----------------
def init_raw_params(key):
    layers_raw = []
    cin = NUM_CHN
    for _ in range(NUM_CNN_LAYERS):
        key, k1, k2, k3, k4, k5, k6 = jax.random.split(key, 7)
        layers_raw.append(dict(
            w=0.1 * jax.random.normal(k1, (NUM_CNN_KERNELS, cin, KERNEL_SIZE), jnp.float32),
            cb=0.1 * jax.random.normal(k2, (NUM_CNN_KERNELS,), jnp.float32),
            gamma=1.0 + 0.1 * jax.random.normal(k3, (NUM_CNN_KERNELS,), jnp.float32),
            beta=0.1 * jax.random.normal(k4, (NUM_CNN_KERNELS,), jnp.float32),
            mean=0.1 * jax.random.normal(k5, (NUM_CNN_KERNELS,), jnp.float32),
            var=1.0 + 0.5 * jax.random.uniform(k6, (NUM_CNN_KERNELS,), jnp.float32),
        ))
        cin = NUM_CNN_KERNELS
    key, kf1, kf2 = jax.random.split(key, 3)
    wfc = 0.1 * jax.random.normal(kf1, (2, NUM_CNN_KERNELS * OUT_CHANNELS), jnp.float32)
    bfc = 0.1 * jax.random.normal(kf2, (2,), jnp.float32)
    return layers_raw, wfc, bfc


def pack_kernel_params(layers_raw, wfc, bfc):
    kp = {}
    length = WIN_LEN
    for idx, lyr in enumerate(layers_raw, start=1):
        l_conv = length - KERNEL_SIZE + 1
        l_pool = l_conv // 2
        scale = lyr["gamma"] / jnp.sqrt(lyr["var"] + BN_EPS)
        shift = (lyr["cb"] - lyr["mean"]) * scale + lyr["beta"]
        # (Cout, Cin, K) -> (K, Cin, Cout) -> (K*Cin, Cout), bf16 for the MXU
        w_packed = jnp.transpose(lyr["w"], (2, 1, 0)).reshape(-1, NUM_CNN_KERNELS)
        kp[f"w{idx}"] = w_packed.astype(jnp.bfloat16)
        kp[f"s{idx}"] = scale.reshape(1, -1)
        kp[f"b{idx}"] = shift.reshape(1, -1)
        length = l_pool
    pmat = jnp.asarray(adaptive_avg_matrix(length, OUT_CHANNELS))        # (O, L_final)
    # torch flatten of (N, C, O) is index c*O + o  ->  wfc_k (2, O, C)
    wfc_k = jnp.transpose(wfc.reshape(2, NUM_CNN_KERNELS, OUT_CHANNELS), (0, 2, 1))
    kp["A"] = jnp.einsum('ol,joc->jlc', pmat, wfc_k).astype(jnp.float32)  # (2, L_final, C)
    kp["bfc"] = bfc.reshape(1, 2)
    kp["pmat"] = pmat                                                     # for the reference
    return kp


# ---------------- pure-JAX reference (PyTorch semantics, NCL) ----------------
def ref_forward(x_ncl, layers_raw, wfc, bfc, pmat):
    h = x_ncl.astype(jnp.float32)
    for lyr in layers_raw:
        k = lyr["w"].shape[2]
        l_out = h.shape[2] - k + 1
        y = jnp.zeros((h.shape[0], lyr["w"].shape[0], l_out), jnp.float32)
        for t in range(k):
            y = y + jnp.einsum('ncl,oc->nol', h[:, :, t:t + l_out], lyr["w"][:, :, t])
        y = y + lyr["cb"][None, :, None]
        y = ((y - lyr["mean"][None, :, None])
             / jnp.sqrt(lyr["var"][None, :, None] + BN_EPS)
             * lyr["gamma"][None, :, None] + lyr["beta"][None, :, None])
        y = jnp.maximum(y, 0.0)
        l_pool = l_out // 2
        h = y[:, :, :2 * l_pool].reshape(y.shape[0], y.shape[1], l_pool, 2).max(axis=3)
    h = jnp.einsum('ncl,ol->nco', h, pmat)          # AdaptiveAvgPool1d
    feat = h.reshape(h.shape[0], -1)                # flatten (channel-major, like torch)
    return feat @ wfc.T + bfc


if __name__ == "__main__":
    key = jax.random.PRNGKey(0)
    key, kx, kp_key = jax.random.split(key, 3)
    x = jax.random.normal(kx, (BATCH, NUM_CHN, WIN_LEN), jnp.float32)   # NCL like PyTorch

    layers_raw, wfc, bfc = init_raw_params(kp_key)
    kparams = pack_kernel_params(layers_raw, wfc, bfc)

    out = detnet_forward(x, kparams)
    out = jax.block_until_ready(out)

    ref = ref_forward(x, layers_raw, wfc, bfc, kparams["pmat"])
    np.testing.assert_allclose(np.asarray(out), np.asarray(ref), rtol=2e-2, atol=2e-2)

    print("KERNEL_OK")
</pallas_src>

<mosaic_0001>
module attributes {stable_mosaic.version = 11 : i64} {
  func.func @detnet_kernel(%arg0: i32, %arg1: memref<1x256x4xf32, #tpu.memory_space<vmem>>, %arg2: memref<12x32xbf16, #tpu.memory_space<vmem>>, %arg3: memref<1x32xf32, #tpu.memory_space<vmem>>, %arg4: memref<1x32xf32, #tpu.memory_space<vmem>>, %arg5: memref<96x32xbf16, #tpu.memory_space<vmem>>, %arg6: memref<1x32xf32, #tpu.memory_space<vmem>>, %arg7: memref<1x32xf32, #tpu.memory_space<vmem>>, %arg8: memref<96x32xbf16, #tpu.memory_space<vmem>>, %arg9: memref<1x32xf32, #tpu.memory_space<vmem>>, %arg10: memref<1x32xf32, #tpu.memory_space<vmem>>, %arg11: memref<2x30x32xf32, #tpu.memory_space<vmem>>, %arg12: memref<1x2xf32, #tpu.memory_space<vmem>>, %arg13: memref<1x1x2xf32, #tpu.memory_space<vmem>>, %arg14: memref<256x32xf32, #tpu.memory_space<vmem>>) attributes {dimension_semantics = [#tpu.dimension_semantics<parallel>], iteration_bounds = array<i64: 2>, scalar_prefetch = 0 : i64, scratch_operands = 1 : i64, tpu.core_type = #tpu.core_type<tc>, window_params = [{transform_indices = @transform_0, window_bounds = array<i64: 1, 256, 4>}, {pipeline_mode = #tpu.pipeline_mode<synchronous>, transform_indices = @transform_1, window_bounds = array<i64: 12, 32>}, {pipeline_mode = #tpu.pipeline_mode<synchronous>, transform_indices = @transform_2, window_bounds = array<i64: 1, 32>}, {pipeline_mode = #tpu.pipeline_mode<synchronous>, transform_indices = @transform_3, window_bounds = array<i64: 1, 32>}, {pipeline_mode = #tpu.pipeline_mode<synchronous>, transform_indices = @transform_4, window_bounds = array<i64: 96, 32>}, {pipeline_mode = #tpu.pipeline_mode<synchronous>, transform_indices = @transform_5, window_bounds = array<i64: 1, 32>}, {pipeline_mode = #tpu.pipeline_mode<synchronous>, transform_indices = @transform_6, window_bounds = array<i64: 1, 32>}, {pipeline_mode = #tpu.pipeline_mode<synchronous>, transform_indices = @transform_7, window_bounds = array<i64: 96, 32>}, {pipeline_mode = #tpu.pipeline_mode<synchronous>, transform_indices = @transform_8, window_bounds = array<i64: 1, 32>}, {pipeline_mode = #tpu.pipeline_mode<synchronous>, transform_indices = @transform_9, window_bounds = array<i64: 1, 32>}, {pipeline_mode = #tpu.pipeline_mode<synchronous>, transform_indices = @transform_10, window_bounds = array<i64: 2, 30, 32>}, {pipeline_mode = #tpu.pipeline_mode<synchronous>, transform_indices = @transform_11, window_bounds = array<i64: 1, 2>}, {transform_indices = @transform_12, window_bounds = array<i64: 1, 1, 2>}]} {
    %c0 = arith.constant 0 : index
    %c0_0 = arith.constant 0 : index
    %c0_1 = arith.constant 0 : index
    %0 = vector.load %arg1[%c0, %c0_0, %c0_1] : memref<1x256x4xf32, #tpu.memory_space<vmem>>, vector<1x256x4xf32>
    %1 = vector.shape_cast %0 : vector<1x256x4xf32> to vector<256x4xf32>
    %2 = vector.extract_strided_slice %1 {offsets = [0, 0], sizes = [254, 4], strides = [1, 1]} : vector<256x4xf32> to vector<254x4xf32>
    %3 = vector.extract_strided_slice %1 {offsets = [1, 0], sizes = [254, 4], strides = [1, 1]} : vector<256x4xf32> to vector<254x4xf32>
    %4 = vector.extract_strided_slice %1 {offsets = [2, 0], sizes = [254, 4], strides = [1, 1]} : vector<256x4xf32> to vector<254x4xf32>
    %5 = tpu.concatenate %2, %3, %4 in 1 : vector<254x4xf32>, vector<254x4xf32>, vector<254x4xf32> -> vector<254x12xf32>
    %6 = arith.truncf %5 : vector<254x12xf32> to vector<254x12xbf16>
    %c0_2 = arith.constant 0 : index
    %c0_3 = arith.constant 0 : index
    %7 = vector.load %arg2[%c0_2, %c0_3] : memref<12x32xbf16, #tpu.memory_space<vmem>>, vector<12x32xbf16>
    %cst = arith.constant dense<0.000000e+00> : vector<254x32xf32>
    %8 = tpu.matmul %6, %7, %cst {dimension_numbers = #tpu.dot_dimension_numbers<[1], [0], [0], [1], [0, 0, 1, 1], [], []>} : vector<254x12xbf16>, vector<12x32xbf16>, vector<254x32xf32> -> vector<254x32xf32>
    %c0_4 = arith.constant 0 : index
    %c0_5 = arith.constant 0 : index
    %9 = vector.load %arg3[%c0_4, %c0_5] : memref<1x32xf32, #tpu.memory_space<vmem>>, vector<1x32xf32>
    %10 = vector.broadcast %9 : vector<1x32xf32> to vector<254x32xf32>
    %11 = arith.mulf %8, %10 : vector<254x32xf32>
    %c0_6 = arith.constant 0 : index
    %c0_7 = arith.constant 0 : index
    %12 = vector.load %arg4[%c0_6, %c0_7] : memref<1x32xf32, #tpu.memory_space<vmem>>, vector<1x32xf32>
    %13 = vector.broadcast %12 : vector<1x32xf32> to vector<254x32xf32>
    %14 = arith.addf %11, %13 : vector<254x32xf32>
    %cst_8 = arith.constant 0.000000e+00 : f32
    %15 = vector.broadcast %cst_8 : f32 to vector<254x32xf32>
    %16 = arith.maximumf %14, %15 : vector<254x32xf32>
    %c0_9 = arith.constant 0 : index
    %c0_10 = arith.constant 0 : index
    %17 = vector.load %arg14[%c0_9, %c0_10] : memref<256x32xf32, #tpu.memory_space<vmem>>, vector<254x32xf32>
    tpu.vector_store %arg14[%c0_9, %c0_10], %16 {strides = array<i32>} : memref<256x32xf32, #tpu.memory_space<vmem>>, vector<254x32xf32>,
    %c0_11 = arith.constant 0 : index
    %c0_12 = arith.constant 0 : index
    %18 = tpu.strided_load %arg14[%c0_11, %c0_12] {strides = array<i32: 2, 1>} : memref<256x32xf32, #tpu.memory_space<vmem>>, vector<127x32xf32>
    %c1 = arith.constant 1 : index
    %c0_13 = arith.constant 0 : index
    %19 = tpu.strided_load %arg14[%c1, %c0_13] {strides = array<i32: 2, 1>} : memref<256x32xf32, #tpu.memory_space<vmem>>, vector<127x32xf32>
    %20 = arith.maximumf %18, %19 : vector<127x32xf32>
    %21 = vector.extract_strided_slice %20 {offsets = [0, 0], sizes = [125, 32], strides = [1, 1]} : vector<127x32xf32> to vector<125x32xf32>
    %22 = vector.extract_strided_slice %20 {offsets = [1, 0], sizes = [125, 32], strides = [1, 1]} : vector<127x32xf32> to vector<125x32xf32>
    %23 = vector.extract_strided_slice %20 {offsets = [2, 0], sizes = [125, 32], strides = [1, 1]} : vector<127x32xf32> to vector<125x32xf32>
    %24 = tpu.concatenate %21, %22, %23 in 1 : vector<125x32xf32>, vector<125x32xf32>, vector<125x32xf32> -> vector<125x96xf32>
    %25 = arith.truncf %24 : vector<125x96xf32> to vector<125x96xbf16>
    %c0_14 = arith.constant 0 : index
    %c0_15 = arith.constant 0 : index
    %26 = vector.load %arg5[%c0_14, %c0_15] : memref<96x32xbf16, #tpu.memory_space<vmem>>, vector<96x32xbf16>
    %cst_16 = arith.constant dense<0.000000e+00> : vector<125x32xf32>
    %27 = tpu.matmul %25, %26, %cst_16 {dimension_numbers = #tpu.dot_dimension_numbers<[1], [0], [0], [1], [0, 0, 1, 1], [], []>} : vector<125x96xbf16>, vector<96x32xbf16>, vector<125x32xf32> -> vector<125x32xf32>
    %c0_17 = arith.constant 0 : index
    %c0_18 = arith.constant 0 : index
    %28 = vector.load %arg6[%c0_17, %c0_18] : memref<1x32xf32, #tpu.memory_space<vmem>>, vector<1x32xf32>
    %29 = vector.broadcast %28 : vector<1x32xf32> to vector<125x32xf32>
    %30 = arith.mulf %27, %29 : vector<125x32xf32>
    %c0_19 = arith.constant 0 : index
    %c0_20 = arith.constant 0 : index
    %31 = vector.load %arg7[%c0_19, %c0_20] : memref<1x32xf32, #tpu.memory_space<vmem>>, vector<1x32xf32>
    %32 = vector.broadcast %31 : vector<1x32xf32> to vector<125x32xf32>
    %33 = arith.addf %30, %32 : vector<125x32xf32>
    %cst_21 = arith.constant 0.000000e+00 : f32
    %34 = vector.broadcast %cst_21 : f32 to vector<125x32xf32>
    %35 = arith.maximumf %33, %34 : vector<125x32xf32>
    %c0_22 = arith.constant 0 : index
    %c0_23 = arith.constant 0 : index
    %36 = vector.load %arg14[%c0_22, %c0_23] : memref<256x32xf32, #tpu.memory_space<vmem>>, vector<125x32xf32>
    tpu.vector_store %arg14[%c0_22, %c0_23], %35 {strides = array<i32>} : memref<256x32xf32, #tpu.memory_space<vmem>>, vector<125x32xf32>,
    %c0_24 = arith.constant 0 : index
    %c0_25 = arith.constant 0 : index
    %37 = tpu.strided_load %arg14[%c0_24, %c0_25] {strides = array<i32: 2, 1>} : memref<256x32xf32, #tpu.memory_space<vmem>>, vector<62x32xf32>
    %c1_26 = arith.constant 1 : index
    %c0_27 = arith.constant 0 : index
    %38 = tpu.strided_load %arg14[%c1_26, %c0_27] {strides = array<i32: 2, 1>} : memref<256x32xf32, #tpu.memory_space<vmem>>, vector<62x32xf32>
    %39 = arith.maximumf %37, %38 : vector<62x32xf32>
    %40 = vector.extract_strided_slice %39 {offsets = [0, 0], sizes = [60, 32], strides = [1, 1]} : vector<62x32xf32> to vector<60x32xf32>
    %41 = vector.extract_strided_slice %39 {offsets = [1, 0], sizes = [60, 32], strides = [1, 1]} : vector<62x32xf32> to vector<60x32xf32>
    %42 = vector.extract_strided_slice %39 {offsets = [2, 0], sizes = [60, 32], strides = [1, 1]} : vector<62x32xf32> to vector<60x32xf32>
    %43 = tpu.concatenate %40, %41, %42 in 1 : vector<60x32xf32>, vector<60x32xf32>, vector<60x32xf32> -> vector<60x96xf32>
    %44 = arith.truncf %43 : vector<60x96xf32> to vector<60x96xbf16>
    %c0_28 = arith.constant 0 : index
    %c0_29 = arith.constant 0 : index
    %45 = vector.load %arg8[%c0_28, %c0_29] : memref<96x32xbf16, #tpu.memory_space<vmem>>, vector<96x32xbf16>
    %cst_30 = arith.constant dense<0.000000e+00> : vector<60x32xf32>
    %46 = tpu.matmul %44, %45, %cst_30 {dimension_numbers = #tpu.dot_dimension_numbers<[1], [0], [0], [1], [0, 0, 1, 1], [], []>} : vector<60x96xbf16>, vector<96x32xbf16>, vector<60x32xf32> -> vector<60x32xf32>
    %c0_31 = arith.constant 0 : index
    %c0_32 = arith.constant 0 : index
    %47 = vector.load %arg9[%c0_31, %c0_32] : memref<1x32xf32, #tpu.memory_space<vmem>>, vector<1x32xf32>
    %48 = vector.broadcast %47 : vector<1x32xf32> to vector<60x32xf32>
    %49 = arith.mulf %46, %48 : vector<60x32xf32>
    %c0_33 = arith.constant 0 : index
    %c0_34 = arith.constant 0 : index
    %50 = vector.load %arg10[%c0_33, %c0_34] : memref<1x32xf32, #tpu.memory_space<vmem>>, vector<1x32xf32>
    %51 = vector.broadcast %50 : vector<1x32xf32> to vector<60x32xf32>
    %52 = arith.addf %49, %51 : vector<60x32xf32>
    %cst_35 = arith.constant 0.000000e+00 : f32
    %53 = vector.broadcast %cst_35 : f32 to vector<60x32xf32>
    %54 = arith.maximumf %52, %53 : vector<60x32xf32>
    %c0_36 = arith.constant 0 : index
    %c0_37 = arith.constant 0 : index
    %55 = vector.load %arg14[%c0_36, %c0_37] : memref<256x32xf32, #tpu.memory_space<vmem>>, vector<60x32xf32>
    tpu.vector_store %arg14[%c0_36, %c0_37], %54 {strides = array<i32>} : memref<256x32xf32, #tpu.memory_space<vmem>>, vector<60x32xf32>,
    %c0_38 = arith.constant 0 : index
    %c0_39 = arith.constant 0 : index
    %56 = tpu.strided_load %arg14[%c0_38, %c0_39] {strides = array<i32: 2, 1>} : memref<256x32xf32, #tpu.memory_space<vmem>>, vector<30x32xf32>
    %c1_40 = arith.constant 1 : index
    %c0_41 = arith.constant 0 : index
    %57 = tpu.strided_load %arg14[%c1_40, %c0_41] {strides = array<i32: 2, 1>} : memref<256x32xf32, #tpu.memory_space<vmem>>, vector<30x32xf32>
    %58 = arith.maximumf %56, %57 : vector<30x32xf32>
    %c0_42 = arith.constant 0 : index
    %c0_43 = arith.constant 0 : index
    %c0_44 = arith.constant 0 : index
    %59 = vector.load %arg11[%c0_42, %c0_43, %c0_44] : memref<2x30x32xf32, #tpu.memory_space<vmem>>, vector<1x30x32xf32>
    %60 = vector.shape_cast %59 : vector<1x30x32xf32> to vector<30x32xf32>
    %61 = arith.mulf %58, %60 : vector<30x32xf32>
    %cst_45 = arith.constant dense<0.000000e+00> : vector<30xf32>
    %62 = vector.multi_reduction <add>, %61, %cst_45 [1] : vector<30x32xf32> to vector<30xf32>
    %63 = vector.shape_cast %62 : vector<30xf32> to vector<30x1xf32>
    %cst_46 = arith.constant dense<0.000000e+00> : vector<1xf32>
    %64 = vector.multi_reduction <add>, %63, %cst_46 [0] : vector<30x1xf32> to vector<1xf32>
    %65 = vector.shape_cast %64 : vector<1xf32> to vector<1x1xf32>
    %c1_47 = arith.constant 1 : index
    %c0_48 = arith.constant 0 : index
    %c0_49 = arith.constant 0 : index
    %66 = vector.load %arg11[%c1_47, %c0_48, %c0_49] : memref<2x30x32xf32, #tpu.memory_space<vmem>>, vector<1x30x32xf32>
    %67 = vector.shape_cast %66 : vector<1x30x32xf32> to vector<30x32xf32>
    %68 = arith.mulf %58, %67 : vector<30x32xf32>
    %cst_50 = arith.constant dense<0.000000e+00> : vector<30xf32>
    %69 = vector.multi_reduction <add>, %68, %cst_50 [1] : vector<30x32xf32> to vector<30xf32>
    %70 = vector.shape_cast %69 : vector<30xf32> to vector<30x1xf32>
    %cst_51 = arith.constant dense<0.000000e+00> : vector<1xf32>
    %71 = vector.multi_reduction <add>, %70, %cst_51 [0] : vector<30x1xf32> to vector<1xf32>
    %72 = vector.shape_cast %71 : vector<1xf32> to vector<1x1xf32>
    %73 = tpu.concatenate %65, %72 in 1 : vector<1x1xf32>, vector<1x1xf32> -> vector<1x2xf32>
    %c0_52 = arith.constant 0 : index
    %c0_53 = arith.constant 0 : index
    %74 = vector.load %arg12[%c0_52, %c0_53] : memref<1x2xf32, #tpu.memory_space<vmem>>, vector<1x2xf32>
    %75 = arith.addf %73, %74 : vector<1x2xf32>
    %c0_54 = arith.constant 0 : index
    %c0_55 = arith.constant 0 : index
    %c0_56 = arith.constant 0 : index
    %76 = vector.load %arg13[%c0_54, %c0_55, %c0_56] : memref<1x1x2xf32, #tpu.memory_space<vmem>>, vector<1x1x2xf32>
    %77 = vector.shape_cast %76 : vector<1x1x2xf32> to vector<1x2xf32>
    %78 = vector.shape_cast %75 : vector<1x2xf32> to vector<1x1x2xf32>
    tpu.vector_store %arg13[%c0_54, %c0_55, %c0_56], %78 {strides = array<i32>} : memref<1x1x2xf32, #tpu.memory_space<vmem>>, vector<1x1x2xf32>,
    return
  }
  func.func @transform_0(%arg0: i32) -> (i32, i32, i32) {
    %c0_i32 = arith.constant 0 : i32
    %c0_i32_0 = arith.constant 0 : i32
    %c0_i32_1 = arith.constant 0 : i32
    return %arg0, %c0_i32, %c0_i32_0 : i32, i32, i32
  }
  func.func @transform_1(%arg0: i32) -> (i32, i32) {
    %c0_i32 = arith.constant 0 : i32
    %c0_i32_0 = arith.constant 0 : i32
    %c0_i32_1 = arith.constant 0 : i32
    return %c0_i32, %c0_i32_0 : i32, i32
  }
  func.func @transform_2(%arg0: i32) -> (i32, i32) {
    %c0_i32 = arith.constant 0 : i32
    %c0_i32_0 = arith.constant 0 : i32
    %c0_i32_1 = arith.constant 0 : i32
    return %c0_i32, %c0_i32_0 : i32, i32
  }
  func.func @transform_3(%arg0: i32) -> (i32, i32) {
    %c0_i32 = arith.constant 0 : i32
    %c0_i32_0 = arith.constant 0 : i32
    %c0_i32_1 = arith.constant 0 : i32
    return %c0_i32, %c0_i32_0 : i32, i32
  }
  func.func @transform_4(%arg0: i32) -> (i32, i32) {
    %c0_i32 = arith.constant 0 : i32
    %c0_i32_0 = arith.constant 0 : i32
    %c0_i32_1 = arith.constant 0 : i32
    return %c0_i32, %c0_i32_0 : i32, i32
  }
  func.func @transform_5(%arg0: i32) -> (i32, i32) {
    %c0_i32 = arith.constant 0 : i32
    %c0_i32_0 = arith.constant 0 : i32
    %c0_i32_1 = arith.constant 0 : i32
    return %c0_i32, %c0_i32_0 : i32, i32
  }
  func.func @transform_6(%arg0: i32) -> (i32, i32) {
    %c0_i32 = arith.constant 0 : i32
    %c0_i32_0 = arith.constant 0 : i32
    %c0_i32_1 = arith.constant 0 : i32
    return %c0_i32, %c0_i32_0 : i32, i32
  }
  func.func @transform_7(%arg0: i32) -> (i32, i32) {
    %c0_i32 = arith.constant 0 : i32
    %c0_i32_0 = arith.constant 0 : i32
    %c0_i32_1 = arith.constant 0 : i32
    return %c0_i32, %c0_i32_0 : i32, i32
  }
  func.func @transform_8(%arg0: i32) -> (i32, i32) {
    %c0_i32 = arith.constant 0 : i32
    %c0_i32_0 = arith.constant 0 : i32
    %c0_i32_1 = arith.constant 0 : i32
    return %c0_i32, %c0_i32_0 : i32, i32
  }
  func.func @transform_9(%arg0: i32) -> (i32, i32) {
    %c0_i32 = arith.constant 0 : i32
    %c0_i32_0 = arith.constant 0 : i32
    %c0_i32_1 = arith.constant 0 : i32
    return %c0_i32, %c0_i32_0 : i32, i32
  }
  func.func @transform_10(%arg0: i32) -> (i32, i32, i32) {
    %c0_i32 = arith.constant 0 : i32
    %c0_i32_0 = arith.constant 0 : i32
    %c0_i32_1 = arith.constant 0 : i32
    %c0_i32_2 = arith.constant 0 : i32
    return %c0_i32, %c0_i32_0, %c0_i32_1 : i32, i32, i32
  }
  func.func @transform_11(%arg0: i32) -> (i32, i32) {
    %c0_i32 = arith.constant 0 : i32
    %c0_i32_0 = arith.constant 0 : i32
    %c0_i32_1 = arith.constant 0 : i32
    return %c0_i32, %c0_i32_0 : i32, i32
  }
  func.func @transform_12(%arg0: i32) -> (i32, i32, i32) {
    %c0_i32 = arith.constant 0 : i32
    %c0_i32_0 = arith.constant 0 : i32
    %c0_i32_1 = arith.constant 0 : i32
    return %arg0, %c0_i32, %c0_i32_0 : i32, i32, i32
  }
}

</mosaic_0001>

<bundles_post_ra>
// kernel: tpu_custom_call.1
= control target key start
LH: loop header
LB: loop body
LE: loop exit
PB: predicated region body
PF: predicated region fallthrough
CT: control target
= control target key end

     0   :  { %s3843_s0 = inlined_call_operand.vmem [shape: f32[2,256,4], index: 0, kind: input, shape index: {}]   ;;  %s3844_s1 = inlined_call_operand.vmem [shape: bf16[12,32], index: 1, kind: input, shape index: {}]   ;;  %s3845_s2 = inlined_call_operand.vmem [shape: f32[1,32], index: 2, kind: input, shape index: {}]   ;;  %s3846_s3 = inlined_call_operand.vmem [shape: f32[1,32], index: 3, kind: input, shape index: {}]   ;;  %s3847_s4 = inlined_call_operand.vmem [shape: bf16[96,32], index: 4, kind: input, shape index: {}]   ;;  %s3848_s5 = inlined_call_operand.vmem [shape: f32[1,32], index: 5, kind: input, shape index: {}]   ;;  %s3849_s6 = inlined_call_operand.vmem [shape: f32[1,32], index: 6, kind: input, shape index: {}]   ;;  %s3850_s7 = inlined_call_operand.vmem [shape: bf16[96,32], index: 7, kind: input, shape index: {}]   ;;  %s3851_s8 = inlined_call_operand.vmem [shape: f32[1,32], index: 8, kind: input, shape index: {}]   ;;  %s3852_s9 = inlined_call_operand.vmem [shape: f32[1,32], index: 9, kind: input, shape index: {}]   ;;  %s3853_s10 = inlined_call_operand.vmem [shape: f32[2,30,32], index: 10, kind: input, shape index: {}]   ;;  %s3854_s11 = inlined_call_operand.vmem [shape: f32[1,2], index: 11, kind: input, shape index: {}]   ;;  %s3855_s12 = inlined_call_operand.hbm [shape: f32[2,1,2], index: 12, kind: output, shape index: {}]  }
   0x1   :  { %3858 = sst [smem:[#allocation6_spill]] %s3843_s0 }
   0x2   :  { %3859 = sst [smem:[#allocation7_spill]] %s3844_s1 }
   0x3   :  { %3860 = sst [smem:[#allocation8_spill]] %s3845_s2 }
   0x4   :  { %17 = vsyncpa [#allocation4], 0 }
   0x5   :  { %19 = vsyncpa [#allocation4 + $0x1], 0  ;;  %s2887_s21 = smov 0   ;;  %s2889_s22 = smov 0  }
   0x6   :  { %s2891_s23 = smov 0   ;;  %s2893_s24 = smov 0  }
   0x7 LB: > { %s2908_s25 = sadd.s32 4294967295, %s2815_s24   ;;  %s2234_s26 = sadd.s32 4294967294, %s2815_s24   ;;  %s2815_s24 = sphi %s2893_s24, %s3870_s24   ;;  %s2811_s23 = sphi %s2891_s23, %s3869_s23   ;;  %s2807_s22 = sphi %s2889_s22, %s3868_s22   ;;  %s2803_s21 = sphi %s2887_s21, %s3867_s21  }
   0x8   : > { %s2912_s27 = sadd.s32 1, %s2815_s24   ;;  %s289_s28 = sadd.s32 1, %s2811_s23 }
   0x9   : > { %s286_s29 = ssub.s32 %s2815_s24, %s2912_s27  ;;  %p299_p0 = scmp.ne.s32.totalorder %s2811_s23, %s2807_s22 }
   0xa   : > { %p287_p1 = scmp.eq.s32.totalorder %s286_s29, 0  ;;  %p300_p2 = scmp.eq.s32.totalorder %s2908_s25, 1 }
   0xb   : > { %p305_p3 = scmp.ne.s32.totalorder %s2807_s22, %s2803_s21  ;;  %p306_p4 = scmp.eq.s32.totalorder %s2234_s26, 1 }
   0xc   : > { %s2923_s30 = scalar_select %p287_p1, %s2811_s23, %s289_s28  }
   0xd   : > { %p2925_p5 = por %p300_p2, %p299_p0  ;;  %p2929_p6 = por %p306_p4, %p305_p3 }
   0xe   : > { %p2237_p7 = scmp.ge.s32.totalorder %s2815_s24, 1  ;;  %p365_p8 = scmp.lt.s32.totalorder %s2815_s24, 3 }
  0x10   : > { %p366_p9 = pnand %p2237_p7, %p365_p8 }
  0x11   : > { %p406_p10 = scmp.lt.s32.totalorder (!%p366_p9), %s2908_s25, 1  ;;  %s3863_s1 = sld [smem:[#allocation7_spill]] (!%p366_p9) }
  0x12   : > { %369 = sbr.rel (%p366_p9) target bundleno = 1297 (0x511), region = 68  ;;  %s3864_s0 = sld [smem:[#allocation6_spill]] (!%p366_p9) }
  0x13   : > { %s2817_s28 = smov (!%p366_p9), 8   ;;  %s2818_s29 = smov (!%p366_p9), 4  }
  0x14   : > { %s3865_s2 = sld [smem:[#allocation8_spill]] (!%p366_p9)  ;;  %s3866_s20 = smov (!%p366_p9), 64  }
  0x15   : > { %s2291_s19 = sshll.u32 (!%p366_p9), %s2908_s25, 4  ;;  %s2821_s17 = smov (!%p366_p9), [#allocation3]  }
  0x16   : > { %s2759_s18 = sshll.u32 (!%p366_p9), %s2821_s17, 4  ;;  %s2760_s18 = int_to_ptr.vmem [resolvable:$false] %s2759_s18 }
  0x17   : > { %s407_s15 = scalar_select %p406_p10, %s2908_s25, 1  ;;  %v2742_v0 = vld [vmem:[%s3863_s1] sm:$0x3f]   ;;  %vm636_vm0 = vcmask 1045504   ;;  %vm476_vm1 = vcmask 1046528   ;;  %vm796_vm2 = vcmask 31744  }
  0x18   : > { %2418 = vmatprep.subr.msk.bf16.mxu0 %vm636_vm0, %v2742_v0  ;;  %v935_v4 = vsel %vm636_vm0, %v2742_v0, 0  ;;  %vm829_vm3 = vcmask 64512   ;;  %vm885_vm4 = vcmask 97280   ;;  %vm1208_vm5 = vcmask 261120   ;;  %s2761_s25 = scalar_lea.vmem %s2760_s18, 32 }
  0x19   : > { %s2294_s16 = sshll.u32 %s407_s15, 8  ;;  %2337 = vmatpush3.bf16.msra.mxu0 %v935_v4  ;;  %vm1240_vm6 = vcmask 259072   ;;  %vm1511_vm7 = vcmask 523264   ;;  %vm1584_vm8 = vcmask 785408   ;;  %vm1783_vm9 = vcmask 258048   ;;  %s2177_s15 = scalar_lea.hbm %s3855_s12, %s2291_s19 }
  0x1a   : > { %s2943_s26 = scalar_lea.vmem %s3864_s0, %s2294_s16  ;;  %vm2085_vm10 = vcmask 257024   ;;  %s404_s16 = sand.u32 1, %s2807_s22   ;;  %vm2160_vm11 = vcmask 7168   ;;  %vm2164_vm12 = vcmask 8192  }
  0x1b   : > { %v2946_v1 = vld [vmem:[%s2943_s26] sm:$0xff]  ;;  %v2949_v2 = vld [vmem:[%s2943_s26 + $0x8] sm:$0xff]  ;;  %v2952_v3 = vld [vmem:[%s2943_s26 + $0x10] sm:$0xff]  ;;  %s2167_s0 = scalar_lea.sflag [#allocation4], %s404_s16 }
  0x1c   : > { %v637_v5 = vrot.slane %v2946_v1, 2  ;;  %v638_v6 = vrot.slane %v2949_v2, 2  ;;  %v640_v7 = vrot.slane %v2952_v3, 2  ;;  %v477_v8 = vrot.slane %v2946_v1, 1  ;;  %v2961_v9 = vld [vmem:[%s2943_s26 + $0x18] sm:$0xff]  ;;  %v2964_v10 = vld [vmem:[%s2943_s26 + $0x20] sm:$0xff] }
  0x1d   : > { %v478_v11 = vrot.slane %v2949_v2, 1  ;;  %v480_v12 = vrot.slane %v2952_v3, 1  ;;  %v642_v13 = vrot.slane %v2961_v9, 2  ;;  %v644_v14 = vrot.slane %v2964_v10, 2  ;;  %v2975_v19 = vld [vmem:[%s2943_s26 + $0x30] sm:$0xff]  ;;  %v2978_v20 = vld [vmem:[%s2943_s26 + $0x38] sm:$0xff] }
  0x1e   : > { %v639_v15 = vsel %vm636_vm0, %v637_v5, %v638_v6  ;;  %v641_v16 = vsel %vm636_vm0, %v638_v6, %v640_v7  ;;  %v482_v17 = vrot.slane %v2961_v9, 1  ;;  %v484_v18 = vrot.slane %v2964_v10, 1  ;;  %v2984_v25 = vld [vmem:[%s2943_s26 + $0x40] sm:$0xff]  ;;  %v2987_v26 = vld [vmem:[%s2943_s26 + $0x28] sm:$0xff]  ;;  %v3001_v39 = vld [vmem:[%s2943_s26 + $0x50] sm:$0xff] }
  0x1f   : > { %v2472_v21 = vpack.i.bf16 %v641_v16, %v639_v15  ;;  %v479_v22 = vsel %vm476_vm1, %v477_v8, %v478_v11  ;;  %v481_v23 = vsel %vm476_vm1, %v478_v11, %v480_v12  ;;  %v643_v24 = vsel %vm636_vm0, %v640_v7, %v642_v13  ;;  %v3007_v43 = vld [vmem:[%s2943_s26 + $0x58] sm:$0xff]  ;;  %v3010_v44 = vld [vmem:[%s2943_s26 + $0x60] sm:$0xff]  ;;  %v3016_v48 = vld [vmem:[%s2943_s26 + $0x48] sm:$0xff] }
  0x20   : > { %v2462_v27 = vpack.i.bf16 %v481_v23, %v479_v22  ;;  %v645_v28 = vsel %vm636_vm0, %v642_v13, %v644_v14  ;;  %v483_v29 = vsel %vm476_vm1, %v480_v12, %v482_v17  ;;  %v485_v30 = vsel %vm476_vm1, %v482_v17, %v484_v18  ;;  %v3033_v63 = vld [vmem:[%s2943_s26 + $0x70] sm:$0xff]  ;;  %v3036_v0 = vld [vmem:[%s2943_s26 + $0x78] sm:$0xff]  ;;  %v3042_v7 = vld [vmem:[%s2943_s26 + $0x80] sm:$0xff] }
  0x21   : > { %2473 = vrot.lane.b32.xlu1 %v2472_v21, %s2817_s28  ;;  %v2477_v31 = vpack.i.bf16 %v645_v28, %v643_v24  ;;  %v2467_v32 = vpack.i.bf16 %v485_v30, %v483_v29  ;;  %v488_v33 = vrot.slane %v2975_v19, 1  ;;  %v490_v34 = vrot.slane %v2978_v20, 1  ;;  %v3048_v13 = vld [vmem:[%s2943_s26 + $0x68] sm:$0xff] }
  0x22   : > { %2463 = vrot.lane.b32.xlu0 %v2462_v27, %s2818_s29  ;;  %v492_v35 = vrot.slane %v2984_v25, 1  ;;  %v486_v36 = vrot.slane %v2987_v26, 1  ;;  %v648_v37 = vrot.slane %v2975_v19, 2  ;;  %v650_v38 = vrot.slane %v2978_v20, 2 }
  0x23   : > { %v491_v40 = vsel %vm476_vm1, %v488_v33, %v490_v34  ;;  %v652_v41 = vrot.slane %v2984_v25, 2  ;;  %v646_v42 = vrot.slane %v2987_v26, 2  ;;  %v496_v52 = vrot.slane %v3001_v39, 1 }
  0x24   : > { %v493_v45 = vsel %vm476_vm1, %v490_v34, %v492_v35  ;;  %v487_v46 = vsel %vm476_vm1, %v484_v18, %v486_v36  ;;  %v489_v47 = vsel %vm476_vm1, %v486_v36, %v488_v33  ;;  %v651_v51 = vsel %vm636_vm0, %v648_v37, %v650_v38  ;;  %v3066_v34 = vld [vmem:[%s2943_s26 + $0x90] sm:$0xff] }
  0x25   : > { %2478 = vrot.lane.b32.xlu1 %v2477_v31, %s2817_s28  ;;  %v2487_v49 = vpack.i.bf16 %v493_v45, %v491_v40  ;;  %v2482_v50 = vpack.i.bf16 %v489_v47, %v487_v46  ;;  %v653_v53 = vsel %vm636_vm0, %v650_v38, %v652_v41  ;;  %v647_v54 = vsel %vm636_vm0, %v644_v14, %v646_v42  ;;  %v3074_v40 = vld [vmem:[%s2943_s26 + $0x98] sm:$0xff] }
  0x26   : > { %2468 = vrot.lane.b32.xlu0 %v2467_v32, %s2818_s29  ;;  %v498_v55 = vrot.slane %v3007_v43, 1  ;;  %v500_v56 = vrot.slane %v3010_v44, 1  ;;  %v649_v57 = vsel %vm636_vm0, %v646_v42, %v648_v37  ;;  %v494_v58 = vrot.slane %v3016_v48, 1  ;;  %v3080_v42 = vld [vmem:[%s2943_s26 + $0x88] sm:$0xff] }
  0x27   : > { %v656_v59 = vrot.slane %v3001_v39, 2  ;;  %v658_v60 = vrot.slane %v3007_v43, 2  ;;  %v660_v61 = vrot.slane %v3010_v44, 2  ;;  %v654_v62 = vrot.slane %v3016_v48, 2 }
  0x28   : > { %v2497_v4 = vpack.i.bf16 %v653_v53, %v651_v51  ;;  %v499_v5 = vsel %vm476_vm1, %v496_v52, %v498_v55  ;;  %v501_v6 = vsel %vm476_vm1, %v498_v55, %v500_v56  ;;  %v2492_v8 = vpack.i.bf16 %v649_v57, %v647_v54 }
  0x29   : > { %2488 = vrot.lane.b32.xlu1 %v2487_v49, %s2818_s29  ;;  %v495_v11 = vsel %vm476_vm1, %v492_v35, %v494_v58  ;;  %v497_v12 = vsel %vm476_vm1, %v494_v58, %v496_v52  ;;  %v2507_v14 = vpack.i.bf16 %v501_v6, %v499_v5  ;;  %v659_v15 = vsel %vm636_vm0, %v656_v59, %v658_v60 }
  0x2a   : > { %2483 = vrot.lane.b32.xlu0 %v2482_v50, %s2818_s29  ;;  %v2502_v16 = vpack.i.bf16 %v497_v12, %v495_v11  ;;  %v661_v17 = vsel %vm636_vm0, %v658_v60, %v660_v61  ;;  %v504_v18 = vrot.slane %v3033_v63, 1  ;;  %v506_v21 = vrot.slane %v3036_v0, 1  ;;  %v3106_v11 = vld [vmem:[%s2943_s26 + $0xb8] sm:$0xff]  ;;  %v3109_v12 = vld [vmem:[%s2943_s26 + $0xc0] sm:$0xff] }
  0x2b   : > { %v655_v22 = vsel %vm636_vm0, %v652_v41, %v654_v62  ;;  %v657_v23 = vsel %vm636_vm0, %v654_v62, %v656_v59  ;;  %v508_v24 = vrot.slane %v3042_v7, 1  ;;  %v502_v27 = vrot.slane %v3048_v13, 1  ;;  %v3077_v41 = vld [vmem:[%s2943_s26 + $0xa0] sm:$0xff] }
  0x2c   : > { %v664_v28 = vrot.slane %v3033_v63, 2  ;;  %v666_v29 = vrot.slane %v3036_v0, 2  ;;  %v2517_v30 = vpack.i.bf16 %v661_v17, %v659_v15  ;;  %v2512_v31 = vpack.i.bf16 %v657_v23, %v655_v22 }
  0x2d   : > { %2498 = vrot.lane.b32.xlu1 %v2497_v4, %s2817_s28  ;;  %v507_v32 = vsel %vm476_vm1, %v504_v18, %v506_v21  ;;  %v668_v33 = vrot.slane %v3042_v7, 2  ;;  %v509_v35 = vsel %vm476_vm1, %v506_v21, %v508_v24  ;;  %v503_v36 = vsel %vm476_vm1, %v500_v56, %v502_v27 }
  0x2e   : > { %2493 = vrot.lane.b32.xlu0 %v2492_v8, %s2817_s28  ;;  %v505_v37 = vsel %vm476_vm1, %v502_v27, %v504_v18  ;;  %v662_v38 = vrot.slane %v3048_v13, 2  ;;  %v667_v45 = vsel %vm636_vm0, %v664_v28, %v666_v29  ;;  %v512_v46 = vrot.slane %v3066_v34, 1  ;;  %v3103_v8 = vld [vmem:[%s2943_s26 + $0xb0] sm:$0xff] }
  0x2f   : > { %v2527_v47 = vpack.i.bf16 %v509_v35, %v507_v32  ;;  %v2522_v49 = vpack.i.bf16 %v505_v37, %v503_v36  ;;  %v669_v50 = vsel %vm636_vm0, %v666_v29, %v668_v33  ;;  %v514_v51 = vrot.slane %v3074_v40, 1  ;;  %v3132_v37 = vld [vmem:[%s2943_s26 + $0xd0] sm:$0xff] }
  0x30   : > { %v663_v52 = vsel %vm636_vm0, %v660_v61, %v662_v38  ;;  %v665_v53 = vsel %vm636_vm0, %v662_v38, %v664_v28  ;;  %v516_v54 = vrot.slane %v3077_v41, 1  ;;  %v510_v55 = vrot.slane %v3080_v42, 1 }
  0x31   : > { %2508 = vrot.lane.b32.xlu1 %v2507_v14, %s2818_s29  ;;  %v2537_v56 = vpack.i.bf16 %v669_v50, %v667_v45  ;;  %v2532_v57 = vpack.i.bf16 %v665_v53, %v663_v52  ;;  %v515_v58 = vsel %vm476_vm1, %v512_v46, %v514_v51  ;;  %v672_v59 = vrot.slane %v3066_v34, 2  ;;  %v3112_v14 = vld [vmem:[%s2943_s26 + $0xa8] sm:$0xff] }
  0x32   : > { %2503 = vrot.lane.b32.xlu0 %v2502_v16, %s2818_s29  ;;  %v674_v60 = vrot.slane %v3074_v40, 2  ;;  %v517_v61 = vsel %vm476_vm1, %v514_v51, %v516_v54  ;;  %v511_v62 = vsel %vm476_vm1, %v508_v24, %v510_v55  ;;  %v513_v4 = vsel %vm476_vm1, %v510_v55, %v512_v46  ;;  %v3144_v50 = vld [vmem:[%s2943_s26 + $0xc8] sm:$0xff] }
  0x33   : > { %v676_v5 = vrot.slane %v3077_v41, 2  ;;  %v670_v6 = vrot.slane %v3080_v42, 2  ;;  %v2547_v15 = vpack.i.bf16 %v517_v61, %v515_v58  ;;  %v2542_v16 = vpack.i.bf16 %v513_v4, %v511_v62 }
  0x34   : > { %v675_v17 = vsel %vm636_vm0, %v672_v59, %v674_v60  ;;  %v520_v21 = vrot.slane %v3103_v8, 1  ;;  %v522_v22 = vrot.slane %v3106_v11, 1  ;;  %v524_v23 = vrot.slane %v3109_v12, 1 }
  0x35   : > { %2518 = vrot.lane.b32.xlu1 %v2517_v30, %s2817_s28  ;;  %v677_v18 = vsel %vm636_vm0, %v674_v60, %v676_v5  ;;  %v671_v24 = vsel %vm636_vm0, %v668_v33, %v670_v6  ;;  %v673_v27 = vsel %vm636_vm0, %v670_v6, %v672_v59  ;;  %v518_v28 = vrot.slane %v3112_v14, 1 }
  0x36   : > { %2513 = vrot.lane.b32.xlu0 %v2512_v31, %s2817_s28  ;;  %v2557_v29 = vpack.i.bf16 %v677_v18, %v675_v17  ;;  %v680_v30 = vrot.slane %v3103_v8, 2  ;;  %v682_v31 = vrot.slane %v3106_v11, 2  ;;  %v2552_v32 = vpack.i.bf16 %v673_v27, %v671_v24  ;;  %v3170_v24 = vld [vmem:[%s2943_s26 + $0xf8] sm:$0xff]  ;;  %v3173_v27 = vld [vmem:[%s2943_s26 + $0xe8] sm:$0xff] }
  0x37   : > { %v523_v35 = vsel %vm476_vm1, %v520_v21, %v522_v22  ;;  %v525_v33 = vsel %vm476_vm1, %v522_v22, %v524_v23  ;;  %v684_v36 = vrot.slane %v3109_v12, 2  ;;  %v519_v38 = vsel %vm476_vm1, %v516_v54, %v518_v28  ;;  %v3167_v22 = vld [vmem:[%s2943_s26 + $0xf0] sm:$0xff] }
  0x38   : > { %v521_v45 = vsel %vm476_vm1, %v518_v28, %v520_v21  ;;  %v678_v46 = vrot.slane %v3112_v14, 2  ;;  %v2567_v51 = vpack.i.bf16 %v525_v33, %v523_v35  ;;  %v683_v52 = vsel %vm636_vm0, %v680_v30, %v682_v31 }
  0x39   : > { %2528 = vrot.lane.b32.xlu1 %v2527_v47, %s2818_s29  ;;  %v3138_v47 = vld [vmem:[%s2943_s26 + $0xd8] sm:$0xff]  ;;  %v528_v53 = vrot.slane %v3132_v37, 1  ;;  %v2562_v54 = vpack.i.bf16 %v521_v45, %v519_v38  ;;  %v685_v55 = vsel %vm636_vm0, %v682_v31, %v684_v36  ;;  %v526_v60 = vrot.slane %v3144_v50, 1 }
  0x3a   : > { %2523 = vrot.lane.b32.xlu0 %v2522_v49, %s2818_s29  ;;  %v3141_v49 = vld [vmem:[%s2943_s26 + $0xe0] sm:$0xff]  ;;  %v679_v58 = vsel %vm636_vm0, %v676_v5, %v678_v46  ;;  %v681_v59 = vsel %vm636_vm0, %v678_v46, %v680_v30  ;;  %v2577_v61 = vpack.i.bf16 %v685_v55, %v683_v52  ;;  %v688_v62 = vrot.slane %v3132_v37, 2 }
  0x3b   : > { %v690_v4 = vrot.slane %v3138_v47, 2  ;;  %v2572_v6 = vpack.i.bf16 %v681_v59, %v679_v58  ;;  %v527_v17 = vsel %vm476_vm1, %v524_v23, %v526_v60  ;;  %v529_v18 = vsel %vm476_vm1, %v526_v60, %v528_v53 }
  0x3c   : > { %v686_v21 = vrot.slane %v3144_v50, 2  ;;  %v2582_v30 = vpack.i.bf16 %v529_v18, %v527_v17  ;;  %v536_v31 = vrot.slane %v3167_v22, 1  ;;  %v534_v38 = vrot.slane %v3173_v27, 1 }
  0x3d   : > { %2538 = vrot.lane.b32.xlu1 %v2537_v56, %s2817_s28  ;;  %v530_v56 = vrot.slane %v3138_v47, 1  ;;  %v696_v52 = vrot.slane %v3167_v22, 2  ;;  %v694_v55 = vrot.slane %v3173_v27, 2 }
  0x3e   : > { %2533 = vrot.lane.b32.xlu0 %v2532_v57, %s2817_s28  ;;  %v532_v57 = vrot.slane %v3141_v49, 1  ;;  %v687_v35 = vsel %vm636_vm0, %v684_v36, %v686_v21  ;;  %v689_v33 = vsel %vm636_vm0, %v686_v21, %v688_v62  ;;  %v537_v36 = vsel %vm476_vm1, %v534_v38, %v536_v31 }
  0x3f   : > { %v2592_v46 = vpack.i.bf16 %v689_v33, %v687_v35 }
  0x40   : > { %v533_v5 = vsel %vm476_vm1, %v530_v56, %v532_v57 }
  0x41   : > { %2548 = vrot.lane.b32.xlu1 %v2547_v15, %s2818_s29  ;;  %v531_v15 = vsel %vm476_vm1, %v528_v53, %v530_v56  ;;  %v698_v53 = vrot.slane %v3170_v24, 2 }
  0x42   : > { %2543 = vrot.lane.b32.xlu0 %v2542_v16, %s2818_s29  ;;  %v692_v16 = vrot.slane %v3141_v49, 2  ;;  %v2587_v28 = vpack.i.bf16 %v533_v5, %v531_v15 }
  0x43   : > { %v699_v59 = vsel %vm636_vm0, %v696_v52, %v698_v53 }
  0x44   : > { %v693_v23 = vsel %vm636_vm0, %v690_v4, %v692_v16  ;;  %v695_v60 = vsel %vm636_vm0, %v692_v16, %v694_v55 }
  0x45   : > { %2558 = vrot.lane.b32.xlu1 %v2557_v29, %s2817_s28  ;;  %v691_v29 = vsel %vm636_vm0, %v688_v62, %v690_v4  ;;  %v2617_v62 = vpack.i.bf16 %v698_v53, %v699_v59 }
  0x46   : > { %2553 = vrot.lane.b32.xlu0 %v2552_v32, %s2817_s28  ;;  %v538_v32 = vrot.slane %v3170_v24, 1  ;;  %v2597_v45 = vpack.i.bf16 %v693_v23, %v691_v29 }
  0x49   : > { %2568 = vrot.lane.b32.xlu1 %v2567_v51, %s2818_s29  ;;  %v539_v51 = vsel %vm476_vm1, %v536_v31, %v538_v32 }
  0x4a   : > { %2563 = vrot.lane.b32.xlu0 %v2562_v54, %s2818_s29  ;;  %v535_v54 = vsel %vm476_vm1, %v532_v57, %v534_v38  ;;  %v2607_v56 = vpack.i.bf16 %v538_v32, %v539_v51 }
  0x4b   : > { %v2602_v58 = vpack.i.bf16 %v537_v36, %v535_v54 }
  0x4d   : > { %2578 = vrot.lane.b32.xlu1 %v2577_v61, %s2817_s28  ;;  %v697_v61 = vsel %vm636_vm0, %v694_v55, %v696_v52 }
  0x4e   : > { %2573 = vrot.lane.b32.xlu0 %v2572_v6, %s2817_s28  ;;  %v2612_v57 = vpack.i.bf16 %v697_v61, %v695_v60 }
  0x51   : > { %2588 = vrot.lane.b32.xlu1 %v2587_v28, %s2818_s29 }
  0x52   : > { %2583 = vrot.lane.b32.xlu0 %v2582_v30, %s2818_s29 }
  0x55   : > { %2598 = vrot.lane.b32.xlu1 %v2597_v45, %s2817_s28 }
  0x56   : > { %2593 = vrot.lane.b32.xlu0 %v2592_v46, %s2817_s28 }
  0x59   : > { %2608 = vrot.lane.b32.xlu1 %v2607_v56, %s2818_s29 }
  0x5a   : > { %2603 = vrot.lane.b32.xlu0 %v2602_v58, %s2818_s29  ;;  %s3856_s29 = smov 64  }
  0x5d   : > { %2618 = vrot.lane.b32.xlu1 %v2617_v62, %s2817_s28 }
  0x5e   : > { %2613 = vrot.lane.b32.xlu0 %v2612_v57, %s2817_s28  ;;  %s2819_s28 = smov 32  }
  0x93   : > { %v2474_v4 = vpop.permute.xlu1 %2473 }
  0x94   : > { %v2476_v6 = vunpack.i.h.bf16 %v2474_v4  ;;  %v2475_v15 = vunpack.i.l.bf16 %v2474_v4  ;;  %v2464_v5 = vpop.permute.xlu0 %2463 }
  0x95   : > { %v2466_v17 = vunpack.i.h.bf16 %v2464_v5  ;;  %v2465_v18 = vunpack.i.l.bf16 %v2464_v5 }
  0x97   : > { %v2479_v16 = vpop.permute.xlu1 %2478  ;;  %v797_v21 = vsel %vm796_vm2, %v2946_v1, %v2465_v18  ;;  %v798_v28 = vsel %vm796_vm2, %v2949_v2, %v2466_v17 }
  0x98   : > { %v2481_v29 = vunpack.i.h.bf16 %v2479_v16  ;;  %v2480_v30 = vunpack.i.l.bf16 %v2479_v16  ;;  %v2469_v23 = vpop.permute.xlu0 %2468  ;;  %v830_v31 = vsel %vm829_vm3, %v797_v21, %v2475_v15  ;;  %v831_v32 = vsel %vm829_vm3, %v798_v28, %v2476_v6 }
  0x99   : > { %v2471_v35 = vunpack.i.h.bf16 %v2469_v23  ;;  %v2470_v33 = vunpack.i.l.bf16 %v2469_v23  ;;  %v862_v38 = vpack.c.bf16 %v831_v32, %v830_v31 }
  0x9b   : > { %v800_v45 = vsel %vm796_vm2, %v2961_v9, %v2471_v35  ;;  %v799_v1 = vsel %vm796_vm2, %v2952_v3, %v2470_v33  ;;  %2338 = vmatprep.mubr.msk.bf16.mxu0 %vm885_vm4, %v862_v38  ;;  %v2489_v2 = vpop.permute.xlu1 %2488 }
  0x9c   : > { %v2484_v46 = vpop.permute.xlu0 %2483  ;;  %v832_v51 = vsel %vm829_vm3, %v799_v1, %v2480_v30  ;;  %v833_v52 = vsel %vm829_vm3, %v800_v45, %v2481_v29  ;;  %v2491_v53 = vunpack.i.h.bf16 %v2489_v2  ;;  %v2490_v54 = vunpack.i.l.bf16 %v2489_v2 }
  0x9d   : > { %v863_v36 = vpack.c.bf16 %v833_v52, %v832_v51  ;;  %v2486_v55 = vunpack.i.h.bf16 %v2484_v46  ;;  %v2485_v56 = vunpack.i.l.bf16 %v2484_v46 }
  0x9e   : > { %v804_v3 = vsel %vm796_vm2, %v2978_v20, %v2491_v53  ;;  %v803_v61 = vsel %vm796_vm2, %v2975_v19, %v2490_v54 }
  0x9f   : > { %2339 = vmatmul.mubr.msk.bf16.vlgmr.msra.gmra.mxu0 %vm885_vm4, %v863_v36  ;;  %v2499_v58 = vpop.permute.xlu1 %2498  ;;  %v802_v4 = vsel %vm796_vm2, %v2987_v26, %v2486_v55  ;;  %v801_v6 = vsel %vm796_vm2, %v2964_v10, %v2485_v56 }
  0xa0   : > { %v2501_v9 = vunpack.i.h.bf16 %v2499_v58  ;;  %v2500_v59 = vunpack.i.l.bf16 %v2499_v58  ;;  %v2494_v60 = vpop.permute.xlu0 %2493 }
  0xa1   : > { %v2496_v62 = vunpack.i.h.bf16 %v2494_v60  ;;  %v2495_v57 = vunpack.i.l.bf16 %v2494_v60 }
  0xa2   : > { %v836_v15 = vsel %vm829_vm3, %v803_v61, %v2500_v59  ;;  %v837_v5 = vsel %vm829_vm3, %v804_v3, %v2501_v9 }
  0xa3   : > { %v865_v17 = vpack.c.bf16 %v837_v5, %v836_v15  ;;  %v834_v18 = vsel %vm829_vm3, %v801_v6, %v2495_v57  ;;  %v835_v20 = vsel %vm829_vm3, %v802_v4, %v2496_v62  ;;  %v2509_v16 = vpop.permute.xlu1 %2508 }
  0xa4   : > { %v864_v21 = vpack.c.bf16 %v835_v20, %v834_v18  ;;  %v2504_v19 = vpop.permute.xlu0 %2503  ;;  %v2511_v28 = vunpack.i.h.bf16 %v2509_v16  ;;  %v2510_v29 = vunpack.i.l.bf16 %v2509_v16 }
  0xa5   : > { %v2506_v30 = vunpack.i.h.bf16 %v2504_v19  ;;  %v2505_v23 = vunpack.i.l.bf16 %v2504_v19 }
  0xa6   : > { %2342 = vmatprep.mubr.msk.bf16.mxu0 %vm885_vm4, %v864_v21  ;;  %v808_v35 = vsel %vm796_vm2, %v3007_v43, %v2511_v28  ;;  %v807_v33 = vsel %vm796_vm2, %v3001_v39, %v2510_v29 }
  0xa7   : > { %2343 = vmatmul.mubr.msk.bf16.gmra.mxu0 %vm885_vm4, %v865_v17  ;;  %v2519_v10 = vpop.permute.xlu1 %2518  ;;  %v806_v1 = vsel %vm796_vm2, %v3016_v48, %v2506_v30  ;;  %v805_v2 = vsel %vm796_vm2, %v2984_v25, %v2505_v23 }
  0xa8   : > { %v2521_v26 = vunpack.i.h.bf16 %v2519_v10  ;;  %v2520_v31 = vunpack.i.l.bf16 %v2519_v10  ;;  %v2514_v32 = vpop.permute.xlu0 %2513 }
  0xa9   : > { %v2516_v38 = vunpack.i.h.bf16 %v2514_v32  ;;  %v2515_v45 = vunpack.i.l.bf16 %v2514_v32 }
  0xaa   : > { %v840_v46 = vsel %vm829_vm3, %v807_v33, %v2520_v31  ;;  %v841_v51 = vsel %vm829_vm3, %v808_v35, %v2521_v26 }
  0xab   : > { %v867_v52 = vpack.c.bf16 %v841_v51, %v840_v46  ;;  %v838_v53 = vsel %vm829_vm3, %v805_v2, %v2515_v45  ;;  %v839_v43 = vsel %vm829_vm3, %v806_v1, %v2516_v38  ;;  %v2529_v54 = vpop.permute.xlu1 %2528 }
  0xac   : > { %v866_v36 = vpack.c.bf16 %v839_v43, %v838_v53  ;;  %v2524_v39 = vpop.permute.xlu0 %2523  ;;  %v2531_v55 = vunpack.i.h.bf16 %v2529_v54  ;;  %v2530_v56 = vunpack.i.l.bf16 %v2529_v54 }
  0xad   : > { %v2526_v58 = vunpack.i.h.bf16 %v2524_v39  ;;  %v2525_v9 = vunpack.i.l.bf16 %v2524_v39 }
  0xae   : > { %2346 = vmatprep.mubr.msk.bf16.mxu0 %vm885_vm4, %v866_v36  ;;  %v812_v3 = vsel %vm796_vm2, %v3036_v0, %v2531_v55  ;;  %v811_v61 = vsel %vm796_vm2, %v3033_v63, %v2530_v56 }
  0xaf   : > { %2347 = vmatmul.mubr.msk.bf16.gmra.mxu0 %vm885_vm4, %v867_v52  ;;  %v2539_v25 = vpop.permute.xlu1 %2538  ;;  %v810_v4 = vsel %vm796_vm2, %v3048_v13, %v2526_v58  ;;  %v809_v6 = vsel %vm796_vm2, %v3010_v44, %v2525_v9 }
  0xb0   : > { %v2541_v48 = vunpack.i.h.bf16 %v2539_v25  ;;  %v2540_v59 = vunpack.i.l.bf16 %v2539_v25  ;;  %v2534_v60 = vpop.permute.xlu0 %2533 }
  0xb1   : > { %v2536_v62 = vunpack.i.h.bf16 %v2534_v60  ;;  %v2535_v57 = vunpack.i.l.bf16 %v2534_v60 }
  0xb2   : > { %v844_v15 = vsel %vm829_vm3, %v811_v61, %v2540_v59  ;;  %v845_v5 = vsel %vm829_vm3, %v812_v3, %v2541_v48 }
  0xb3   : > { %v869_v17 = vpack.c.bf16 %v845_v5, %v844_v15  ;;  %v842_v18 = vsel %vm829_vm3, %v809_v6, %v2535_v57  ;;  %v843_v0 = vsel %vm829_vm3, %v810_v4, %v2536_v62  ;;  %v2549_v20 = vpop.permute.xlu1 %2548 }
  0xb4   : > { %v868_v16 = vpack.c.bf16 %v843_v0, %v842_v18  ;;  %v2544_v63 = vpop.permute.xlu0 %2543  ;;  %v2551_v21 = vunpack.i.h.bf16 %v2549_v20  ;;  %v2550_v19 = vunpack.i.l.bf16 %v2549_v20 }
  0xb5   : > { %v2546_v28 = vunpack.i.h.bf16 %v2544_v63  ;;  %v2545_v29 = vunpack.i.l.bf16 %v2544_v63 }
  0xb6   : > { %2350 = vmatprep.mubr.msk.bf16.mxu0 %vm885_vm4, %v868_v16  ;;  %v816_v10 = vsel %vm796_vm2, %v3074_v40, %v2551_v21  ;;  %v815_v26 = vsel %vm796_vm2, %v3066_v34, %v2550_v19 }
  0xb7   : > { %2351 = vmatmul.mubr.msk.bf16.gmra.mxu0 %vm885_vm4, %v869_v17  ;;  %v2559_v44 = vpop.permute.xlu1 %2558  ;;  %v814_v35 = vsel %vm796_vm2, %v3080_v42, %v2546_v28  ;;  %v813_v33 = vsel %vm796_vm2, %v3042_v7, %v2545_v29 }
  0xb8   : > { %v2561_v13 = vunpack.i.h.bf16 %v2559_v44  ;;  %v2560_v30 = vunpack.i.l.bf16 %v2559_v44  ;;  %v2554_v23 = vpop.permute.xlu0 %2553 }
  0xb9   : > { %v2556_v31 = vunpack.i.h.bf16 %v2554_v23  ;;  %v2555_v32 = vunpack.i.l.bf16 %v2554_v23 }
  0xba   : > { %v848_v38 = vsel %vm829_vm3, %v815_v26, %v2560_v30  ;;  %v849_v45 = vsel %vm829_vm3, %v816_v10, %v2561_v13 }
  0xbb   : > { %v871_v1 = vpack.c.bf16 %v849_v45, %v848_v38  ;;  %v846_v2 = vsel %vm829_vm3, %v813_v33, %v2555_v32  ;;  %v847_v40 = vsel %vm829_vm3, %v814_v35, %v2556_v31  ;;  %v2569_v46 = vpop.permute.xlu1 %2568 }
  0xbc   : > { %v870_v51 = vpack.c.bf16 %v847_v40, %v846_v2  ;;  %v2564_v34 = vpop.permute.xlu0 %2563  ;;  %v2571_v52 = vunpack.i.h.bf16 %v2569_v46  ;;  %v2570_v53 = vunpack.i.l.bf16 %v2569_v46 }
  0xbd   : > { %v2566_v43 = vunpack.i.h.bf16 %v2564_v34  ;;  %v2565_v54 = vunpack.i.l.bf16 %v2564_v34 }
  0xbe   : > { %2354 = vmatprep.mubr.msk.bf16.mxu0 %vm885_vm4, %v870_v51  ;;  %v820_v55 = vsel %vm796_vm2, %v3106_v11, %v2571_v52  ;;  %v819_v56 = vsel %vm796_vm2, %v3103_v8, %v2570_v53 }
  0xbf   : > { %2355 = vmatmul.mubr.msk.bf16.gmra.mxu0 %vm885_vm4, %v871_v1  ;;  %v2579_v7 = vpop.permute.xlu1 %2578  ;;  %v818_v25 = vsel %vm796_vm2, %v3112_v14, %v2566_v43  ;;  %v817_v48 = vsel %vm796_vm2, %v3077_v41, %v2565_v54 }
  0xc0   : > { %v2581_v42 = vunpack.i.h.bf16 %v2579_v7  ;;  %v2580_v36 = vunpack.i.l.bf16 %v2579_v7  ;;  %v2574_v39 = vpop.permute.xlu0 %2573  ;;  %v3327_v7 = vld [vmem:[%s3846_s3] ss:$0 sm:$0xff] }
  0xc1   : > { %v2576_v58 = vunpack.i.h.bf16 %v2574_v39  ;;  %v2575_v9 = vunpack.i.l.bf16 %v2574_v39 }
  0xc2   : > { %v852_v59 = vsel %vm829_vm3, %v819_v56, %v2580_v36  ;;  %v853_v60 = vsel %vm829_vm3, %v820_v55, %v2581_v42 }
  0xc3   : > { %v873_v3 = vpack.c.bf16 %v853_v60, %v852_v59  ;;  %v850_v61 = vsel %vm829_vm3, %v817_v48, %v2575_v9  ;;  %v851_v11 = vsel %vm829_vm3, %v818_v25, %v2576_v58  ;;  %v2589_v62 = vpop.permute.xlu1 %2588 }
  0xc4   : > { %v872_v57 = vpack.c.bf16 %v851_v11, %v850_v61  ;;  %v2584_v8 = vpop.permute.xlu0 %2583  ;;  %v2591_v4 = vunpack.i.h.bf16 %v2589_v62  ;;  %v2590_v6 = vunpack.i.l.bf16 %v2589_v62 }
  0xc5   : > { %v2586_v15 = vunpack.i.h.bf16 %v2584_v8  ;;  %v2585_v5 = vunpack.i.l.bf16 %v2584_v8 }
  0xc6   : > { %2358 = vmatprep.mubr.msk.bf16.mxu0 %vm885_vm4, %v872_v57  ;;  %v824_v0 = vsel %vm796_vm2, %v3138_v47, %v2591_v4  ;;  %v823_v20 = vsel %vm796_vm2, %v3132_v37, %v2590_v6 }
  0xc7   : > { %2359 = vmatmul.mubr.msk.bf16.gmra.mxu0 %vm885_vm4, %v873_v3  ;;  %v2599_v41 = vpop.permute.xlu1 %2598  ;;  %v822_v21 = vsel %vm796_vm2, %v3144_v50, %v2586_v15  ;;  %v821_v19 = vsel %vm796_vm2, %v3109_v12, %v2585_v5 }
  0xc8   : > { %v2601_v14 = vunpack.i.h.bf16 %v2599_v41  ;;  %v2600_v17 = vunpack.i.l.bf16 %v2599_v41  ;;  %v2594_v18 = vpop.permute.xlu0 %2593 }
  0xc9   : > { %v2596_v16 = vunpack.i.h.bf16 %v2594_v18  ;;  %v2595_v63 = vunpack.i.l.bf16 %v2594_v18 }
  0xca   : > { %v856_v28 = vsel %vm829_vm3, %v823_v20, %v2600_v17  ;;  %v857_v29 = vsel %vm829_vm3, %v824_v0, %v2601_v14 }
  0xcb   : > { %v875_v44 = vpack.c.bf16 %v857_v29, %v856_v28  ;;  %v854_v13 = vsel %vm829_vm3, %v821_v19, %v2595_v63  ;;  %v855_v47 = vsel %vm829_vm3, %v822_v21, %v2596_v16  ;;  %v2609_v30 = vpop.permute.xlu1 %2608 }
  0xcc   : > { %v874_v23 = vpack.c.bf16 %v855_v47, %v854_v13  ;;  %v2604_v37 = vpop.permute.xlu0 %2603  ;;  %v2611_v10 = vunpack.i.h.bf16 %v2609_v30  ;;  %v2610_v26 = vunpack.i.l.bf16 %v2609_v30 }
  0xcd   : > { %v2606_v31 = vunpack.i.h.bf16 %v2604_v37  ;;  %v2605_v32 = vunpack.i.l.bf16 %v2604_v37 }
  0xce   : > { %2362 = vmatprep.mubr.msk.bf16.mxu0 %vm885_vm4, %v874_v23  ;;  %v828_v38 = vsel %vm796_vm2, %v3170_v24, %v2611_v10  ;;  %v827_v45 = vsel %vm796_vm2, %v3167_v22, %v2610_v26  ;;  %v2743_v22 = vld [vmem:[%s3847_s4 + $0x28] sm:$0xff]  }
  0xcf   : > { %2363 = vmatmul.mubr.msk.bf16.gmra.mxu0 %vm885_vm4, %v875_v44  ;;  %v2619_v12 = vpop.permute.xlu1 %2618  ;;  %v826_v40 = vsel %vm796_vm2, %v3173_v27, %v2606_v31  ;;  %v825_v46 = vsel %vm796_vm2, %v3141_v49, %v2605_v32  ;;  %v2744_v49 = vld [vmem:[%s3847_s4 + $0x20] sm:$0xff]   ;;  %2370 = vmatprep.subr.bf16.mxu1 %v2743_v22 }
  0xd0   : > { %v2621_v50 = vunpack.i.h.bf16 %v2619_v12  ;;  %v2620_v35 = vunpack.i.l.bf16 %v2619_v12  ;;  %v2614_v33 = vpop.permute.xlu0 %2613  ;;  %2371 = vmatpush3.bf16.msra.mxu1 %v2743_v22  ;;  %v3322_v27 = vld [vmem:[%s3865_s2] ss:$0 sm:$0xff]  ;;  %v2746_v22 = vld [vmem:[%s3847_s4 + $0x10] sm:$0xff]  }
  0xd1   : > { %v2616_v1 = vunpack.i.h.bf16 %v2614_v33  ;;  %v2615_v2 = vunpack.i.l.bf16 %v2614_v33  ;;  %2372 = vmatprep.subr.bf16.mxu1 %v2744_v49 }
  0xd2   : > { %v860_v51 = vsel %vm829_vm3, %v827_v45, %v2620_v35  ;;  %v861_v34 = vsel %vm829_vm3, %v828_v38, %v2621_v50  ;;  %v2745_v45 = vld [vmem:[%s3847_s4 + $0x18] sm:$0xff]  }
  0xd3   : > { %v877_v52 = vpack.c.bf16 %v861_v34, %v860_v51  ;;  %v858_v53 = vsel %vm829_vm3, %v825_v46, %v2615_v2  ;;  %v859_v24 = vsel %vm829_vm3, %v826_v40, %v2616_v1 }
  0xd4   : > { %v876_v43 = vpack.c.bf16 %v859_v24, %v858_v53  ;;  %2373 = vmatpush3.bf16.msra.mxu1 %v2744_v49 }
  0xd5   : > { %2374 = vmatprep.subr.bf16.mxu1 %v2745_v45 }
  0xd6   : > { %2366 = vmatprep.mubr.msk.bf16.mxu0 %vm885_vm4, %v876_v43 }
  0xd7   : > { %2367 = vmatmul.mubr.msk.bf16.gmra.mxu0 %vm885_vm4, %v877_v52 }
  0xd8   : > { %2375 = vmatpush3.bf16.msra.mxu1 %v2745_v45 }
  0xd9   : > { %2376 = vmatprep.subr.bf16.mxu1 %v2746_v22 }
  0xdc   : > { %2377 = vmatpush3.bf16.msra.mxu1 %v2746_v22 }
 0x15f   : > { %v2340_v54 = vpop.f32.mrf.mxu0 }
 0x160   : > { %v1107_v42 = vmul.f32 %v2340_v54, %v3322_v27 }
 0x161   : > { %v971_v36 = vpop.f32.mrf.mxu0 }
 0x162   : > { %v1146_v39 = vadd.f32 %v3327_v7, %v1107_v42  ;;  %v1105_v55 = vmul.f32 %v3322_v27, %v971_v36 }
 0x163   : > { %v2341_v56 = vpop.f32.mrf.mxu0 }
 0x164   : > { %v1178_v58 = vmax.f32 %v1146_v39, 0.0  ;;  %v1144_v9 = vadd.f32 %v3327_v7, %v1105_v55  ;;  %v1108_v25 = vmul.f32 %v2341_v56, %v3322_v27 }
 0x165   : > { %v974_v48 = vpop.f32.mrf.mxu0 }
 0x166   : > { %1211 = vst.msk [vmem:[#allocation2 + $0x10] sm:$0xff] %vm1208_vm5, %v1178_v58  ;;  %v1176_v59 = vmax.f32 %v1144_v9, 0.0  ;;  %v1147_v60 = vadd.f32 %v3327_v7, %v1108_v25  ;;  %v1106_v3 = vmul.f32 %v3322_v27, %v974_v48 }
 0x167   : > { %v2344_v61 = vpop.f32.mrf.mxu0 }
 0x168   : > { %1209 = vst.msk [vmem:[#allocation2] sm:$0xff] %vm1208_vm5, %v1176_v59  ;;  %v1179_v11 = vmax.f32 %v1147_v60, 0.0  ;;  %v1145_v62 = vadd.f32 %v3327_v7, %v1106_v3  ;;  %v1111_v57 = vmul.f32 %v2344_v61, %v3322_v27 }
 0x169   : > { %v987_v8 = vpop.f32.mrf.mxu0 }
 0x16a   : > { %1212 = vst.msk [vmem:[#allocation2 + $0x18] sm:$0xff] %vm1208_vm5, %v1179_v11  ;;  %v1177_v4 = vmax.f32 %v1145_v62, 0.0  ;;  %v1150_v6 = vadd.f32 %v3327_v7, %v1111_v57  ;;  %v1109_v15 = vmul.f32 %v3322_v27, %v987_v8  ;;  %v2747_v62 = vld [vmem:[%s3847_s4 + $0x8] sm:$0xff]  }
 0x16b   : > { %v2345_v5 = vpop.f32.mrf.mxu0  ;;  %2378 = vmatprep.subr.bf16.mxu1 %v2747_v62 }
 0x16c   : > { %1210 = vst.msk [vmem:[#allocation2 + $0x8] sm:$0xff] %vm1208_vm5, %v1177_v4  ;;  %v1182_v41 = vmax.f32 %v1150_v6, 0.0  ;;  %v1148_v14 = vadd.f32 %v3327_v7, %v1109_v15  ;;  %v1112_v17 = vmul.f32 %v2345_v5, %v3322_v27  ;;  %2379 = vmatpush3.bf16.msra.mxu1 %v2747_v62 }
 0x16d   : > { %v990_v18 = vpop.f32.mrf.mxu0 }
 0x16e   : > { %1215 = vst.msk [vmem:[#allocation2 + $0x30] sm:$0xff] %vm1208_vm5, %v1182_v41  ;;  %v1180_v0 = vmax.f32 %v1148_v14, 0.0  ;;  %v1151_v20 = vadd.f32 %v3327_v7, %v1112_v17  ;;  %v1110_v16 = vmul.f32 %v3322_v27, %v990_v18 }
 0x16f   : > { %v2348_v63 = vpop.f32.mrf.mxu0 }
 0x170   : > { %1213 = vst.msk [vmem:[#allocation2 + $0x20] sm:$0xff] %vm1208_vm5, %v1180_v0  ;;  %v1183_v21 = vmax.f32 %v1151_v20, 0.0  ;;  %v1149_v19 = vadd.f32 %v3327_v7, %v1110_v16  ;;  %v1115_v28 = vmul.f32 %v2348_v63, %v3322_v27 }
 0x171   : > { %v1003_v29 = vpop.f32.mrf.mxu0  ;;  %v1244_v33 = vld [vmem:[#allocation2 + $0x10] ss:$2 sm:$0xff]  ;;  %v1276_v38 = vld [vmem:[#allocation2 + $0x11] ss:$2 sm:$0xff] }
 0x172   : > { %1216 = vst.msk [vmem:[#allocation2 + $0x38] sm:$0xff] %vm1208_vm5, %v1183_v21  ;;  %v1181_v44 = vmax.f32 %v1149_v19, 0.0  ;;  %v1154_v13 = vadd.f32 %v3327_v7, %v1115_v28  ;;  %v1113_v47 = vmul.f32 %v3322_v27, %v1003_v29  ;;  %v3369_v52 = vmax.f32 %v1244_v33, %v1276_v38  ;;  %v2748_v28 = vld [vmem:[%s3847_s4] sm:$0xff]  }
 0x173   : > { %v2349_v30 = vpop.f32.mrf.mxu0  ;;  %v1242_v26 = vld [vmem:[#allocation2] ss:$2 sm:$0xff]  ;;  %v1274_v31 = vld [vmem:[#allocation2 + $0x1] ss:$2 sm:$0xff]  ;;  %2380 = vmatprep.subr.bf16.mxu1 %v2748_v28 }
 0x174   : > { %1214 = vst.msk [vmem:[#allocation2 + $0x28] sm:$0xff] %vm1208_vm5, %v1181_v44  ;;  %v1186_v23 = vmax.f32 %v1154_v13, 0.0  ;;  %v1152_v37 = vadd.f32 %v3327_v7, %v1113_v47  ;;  %v1116_v10 = vmul.f32 %v2349_v30, %v3322_v27  ;;  %v3364_v2 = vmax.f32 %v1242_v26, %v1274_v31  ;;  %2381 = vmatpush3.bf16.msra.mxu1 %v2748_v28 }
 0x175   : > { %v1006_v32 = vpop.f32.mrf.mxu0  ;;  %v1338_v25 = vrot.slane %v3369_v52, 1  ;;  %v1417_v6 = vrot.slane %v3369_v52, 2 }
 0x176   : > { %1219 = vst.msk [vmem:[#allocation2 + $0x50] sm:$0xff] %vm1208_vm5, %v1186_v23  ;;  %v1184_v12 = vmax.f32 %v1152_v37, 0.0  ;;  %v1155_v50 = vadd.f32 %v3327_v7, %v1116_v10  ;;  %v1114_v35 = vmul.f32 %v3322_v27, %v1006_v32  ;;  %v1337_v36 = vrot.slane %v3364_v2, 1 }
 0x177   : > { %v2352_v1 = vpop.f32.mrf.mxu0  ;;  %v1416_v4 = vrot.slane %v3364_v2, 2 }
 0x178   : > { %1217 = vst.msk [vmem:[#allocation2 + $0x40] sm:$0xff] %vm1208_vm5, %v1184_v12  ;;  %v1187_v40 = vmax.f32 %v1155_v50, 0.0  ;;  %v1153_v46 = vadd.f32 %v3327_v7, %v1114_v35  ;;  %v1119_v51 = vmul.f32 %v2352_v1, %v3322_v27  ;;  %v1339_v8 = vsel %vm476_vm1, %v1337_v36, %v1338_v25 }
 0x179   : > { %v1019_v34 = vpop.f32.mrf.mxu0  ;;  %v1248_v48 = vld [vmem:[#allocation2 + $0x30] ss:$2 sm:$0xff]  ;;  %v1280_v11 = vld [vmem:[#allocation2 + $0x31] ss:$2 sm:$0xff]  ;;  %v1418_v44 = vsel %vm636_vm0, %v1416_v4, %v1417_v6 }
 0x17a   : > { %1220 = vst.msk [vmem:[#allocation2 + $0x58] sm:$0xff] %vm1208_vm5, %v1187_v40  ;;  %v1185_v53 = vmax.f32 %v1153_v46, 0.0  ;;  %v1158_v24 = vadd.f32 %v3327_v7, %v1119_v51  ;;  %v1117_v43 = vmul.f32 %v3322_v27, %v1019_v34  ;;  %v3399_v20 = vmax.f32 %v1248_v48, %v1280_v11 }
 0x17b   : > { %v2353_v49 = vpop.f32.mrf.mxu0  ;;  %v1246_v54 = vld [vmem:[#allocation2 + $0x20] ss:$2 sm:$0xff]  ;;  %v1278_v42 = vld [vmem:[#allocation2 + $0x21] ss:$2 sm:$0xff] }
 0x17c   : > { %1218 = vst.msk [vmem:[#allocation2 + $0x48] sm:$0xff] %vm1208_vm5, %v1185_v53  ;;  %v1190_v39 = vmax.f32 %v1158_v24, 0.0  ;;  %v1156_v55 = vadd.f32 %v3327_v7, %v1117_v43  ;;  %v1120_v56 = vmul.f32 %v2353_v49, %v3322_v27  ;;  %v3381_v58 = vmax.f32 %v1246_v54, %v1278_v42 }
 0x17d   : > { %v1022_v9 = vpop.f32.mrf.mxu0  ;;  %v1342_v32 = vrot.slane %v3399_v20, 1  ;;  %v1421_v46 = vrot.slane %v3399_v20, 2 }
 0x17e   : > { %1223 = vst.msk [vmem:[#allocation2 + $0x70] sm:$0xff] %vm1208_vm5, %v1190_v39  ;;  %v1188_v59 = vmax.f32 %v1156_v55, 0.0  ;;  %v1159_v60 = vadd.f32 %v3327_v7, %v1120_v56  ;;  %v1118_v3 = vmul.f32 %v3322_v27, %v1022_v9  ;;  %v1340_v61 = vrot.slane %v3381_v58, 1 }
 0x17f   : > { %v2356_v57 = vpop.f32.mrf.mxu0  ;;  %v1419_v15 = vrot.slane %v3381_v58, 2 }
 0x180   : > { %1221 = vst.msk [vmem:[#allocation2 + $0x60] sm:$0xff] %vm1208_vm5, %v1188_v59  ;;  %v1191_v5 = vmax.f32 %v1159_v60, 0.0  ;;  %v1157_v41 = vadd.f32 %v3327_v7, %v1118_v3  ;;  %v1123_v14 = vmul.f32 %v2356_v57, %v3322_v27  ;;  %v1341_v17 = vsel %vm476_vm1, %v1338_v25, %v1340_v61 }
 0x181   : > { %v1035_v18 = vpop.f32.mrf.mxu0  ;;  %v2622_v0 = vpack.i.bf16 %v1341_v17, %v1339_v8  ;;  %v1420_v19 = vsel %vm636_vm0, %v1417_v6, %v1419_v15  ;;  %v1252_v38 = vld [vmem:[#allocation2 + $0x50] ss:$2 sm:$0xff]  ;;  %v1284_v45 = vld [vmem:[#allocation2 + $0x51] ss:$2 sm:$0xff]  ;;  %v1343_v40 = vsel %vm476_vm1, %v1340_v61, %v1342_v32  ;;  %v1422_v9 = vsel %vm636_vm0, %v1419_v15, %v1421_v46 }
 0x182   : > { %1224 = vst.msk [vmem:[#allocation2 + $0x78] sm:$0xff] %vm1208_vm5, %v1191_v5  ;;  %v1189_v16 = vmax.f32 %v1157_v41, 0.0  ;;  %v1162_v63 = vadd.f32 %v3327_v7, %v1123_v14  ;;  %v1121_v21 = vmul.f32 %v3322_v27, %v1035_v18  ;;  %v2627_v31 = vpack.i.bf16 %v1420_v19, %v1418_v44 }
 0x183   : > { %2623 = vrot.lane.b32.xlu0 %v2622_v0, %s2819_s28  ;;  %v2357_v29 = vpop.f32.mrf.mxu0  ;;  %v1250_v13 = vld [vmem:[#allocation2 + $0x40] ss:$2 sm:$0xff]  ;;  %v1282_v47 = vld [vmem:[#allocation2 + $0x41] ss:$2 sm:$0xff]  ;;  %v3428_v54 = vmax.f32 %v1252_v38, %v1284_v45 }
 0x184   : > { %1222 = vst.msk [vmem:[#allocation2 + $0x68] sm:$0xff] %vm1208_vm5, %v1189_v16  ;;  %v1194_v30 = vmax.f32 %v1162_v63, 0.0  ;;  %v1160_v23 = vadd.f32 %v3327_v7, %v1121_v21  ;;  %v1124_v37 = vmul.f32 %v2357_v29, %v3322_v27  ;;  %v3413_v10 = vmax.f32 %v1250_v13, %v1282_v47 }
 0x185   : > { %v1038_v26 = vpop.f32.mrf.mxu0  ;;  %v1346_v57 = vrot.slane %v3428_v54, 1  ;;  %v1425_v18 = vrot.slane %v3428_v54, 2 }
 0x186   : > { %1227 = vst.msk [vmem:[#allocation2 + $0x90] sm:$0xff] %vm1208_vm5, %v1194_v30  ;;  %v1192_v12 = vmax.f32 %v1160_v23, 0.0  ;;  %v1163_v50 = vadd.f32 %v3327_v7, %v1124_v37  ;;  %v1122_v35 = vmul.f32 %v3322_v27, %v1038_v26  ;;  %v1344_v33 = vrot.slane %v3413_v10, 1 }
 0x187   : > { %2628 = vrot.lane.b32.xlu0 %v2627_v31, %s3856_s29  ;;  %v2360_v1 = vpop.f32.mrf.mxu0  ;;  %v1423_v51 = vrot.slane %v3413_v10, 2 }
 0x188   : > { %1225 = vst.msk [vmem:[#allocation2 + $0x80] sm:$0xff] %vm1208_vm5, %v1192_v12  ;;  %v1195_v34 = vmax.f32 %v1163_v50, 0.0  ;;  %v1161_v53 = vadd.f32 %v3327_v7, %v1122_v35  ;;  %v1127_v24 = vmul.f32 %v2360_v1, %v3322_v27  ;;  %v1345_v43 = vsel %vm476_vm1, %v1342_v32, %v1344_v33 }
 0x189   : > { %v1051_v22 = vpop.f32.mrf.mxu0  ;;  %v2632_v49 = vpack.i.bf16 %v1345_v43, %v1343_v40  ;;  %v1424_v55 = vsel %vm636_vm0, %v1421_v46, %v1423_v51  ;;  %v1256_v5 = vld [vmem:[#allocation2 + $0x70] ss:$2 sm:$0xff]  ;;  %v1288_v41 = vld [vmem:[#allocation2 + $0x71] ss:$2 sm:$0xff]  ;;  %v1347_v17 = vsel %vm476_vm1, %v1344_v33, %v1346_v57  ;;  %v1426_v26 = vsel %vm636_vm0, %v1423_v51, %v1425_v18 }
 0x18a   : > { %1228 = vst.msk [vmem:[#allocation2 + $0x98] sm:$0xff] %vm1208_vm5, %v1195_v34  ;;  %v1193_v42 = vmax.f32 %v1161_v53, 0.0  ;;  %v1166_v36 = vadd.f32 %v3327_v7, %v1127_v24  ;;  %v1125_v39 = vmul.f32 %v3322_v27, %v1051_v22  ;;  %v2637_v62 = vpack.i.bf16 %v1424_v55, %v1422_v9 }
 0x18b   : > { %2633 = vrot.lane.b32.xlu1 %v2632_v49, %s2819_s28  ;;  %v2361_v56 = vpop.f32.mrf.mxu0  ;;  %v1254_v25 = vld [vmem:[#allocation2 + $0x60] ss:$2 sm:$0xff]  ;;  %v1286_v48 = vld [vmem:[#allocation2 + $0x61] ss:$2 sm:$0xff]  ;;  %v3454_v44 = vmax.f32 %v1256_v5, %v1288_v41 }
 0x18c   : > { %1226 = vst.msk [vmem:[#allocation2 + $0x88] sm:$0xff] %vm1208_vm5, %v1193_v42  ;;  %v1198_v59 = vmax.f32 %v1166_v36, 0.0  ;;  %v1164_v60 = vadd.f32 %v3327_v7, %v1125_v39  ;;  %v1128_v3 = vmul.f32 %v2361_v56, %v3322_v27  ;;  %v3439_v61 = vmax.f32 %v1254_v25, %v1286_v48 }
 0x18d   : > { %v1054_v11 = vpop.f32.mrf.mxu0  ;;  %v1350_v1 = vrot.slane %v3454_v44, 1  ;;  %v1429_v49 = vrot.slane %v3454_v44, 2 }
 0x18e   : > { %1231 = vst.msk [vmem:[#allocation2 + $0xb0] sm:$0xff] %vm1208_vm5, %v1198_v59  ;;  %v1196_v8 = vmax.f32 %v1164_v60, 0.0  ;;  %v1167_v4 = vadd.f32 %v3327_v7, %v1128_v3  ;;  %v1126_v6 = vmul.f32 %v3322_v27, %v1054_v11  ;;  %v1348_v15 = vrot.slane %v3439_v61, 1 }
 0x18f   : > { %2638 = vrot.lane.b32.xlu1 %v2637_v62, %s3856_s29  ;;  %v2364_v14 = vpop.f32.mrf.mxu0  ;;  %v1427_v0 = vrot.slane %v3439_v61, 2 }
 0x190   : > { %1229 = vst.msk [vmem:[#allocation2 + $0xa0] sm:$0xff] %vm1208_vm5, %v1196_v8  ;;  %v1199_v16 = vmax.f32 %v1167_v4, 0.0  ;;  %v1165_v63 = vadd.f32 %v3327_v7, %v1126_v6  ;;  %v1131_v21 = vmul.f32 %v2364_v14, %v3322_v27  ;;  %v1349_v19 = vsel %vm476_vm1, %v1346_v57, %v1348_v15 }
 0x191   : > { %v1067_v28 = vpop.f32.mrf.mxu0  ;;  %v2642_v29 = vpack.i.bf16 %v1349_v19, %v1347_v17  ;;  %v1428_v23 = vsel %vm636_vm0, %v1425_v18, %v1427_v0  ;;  %v1260_v53 = vld [vmem:[#allocation2 + $0x90] ss:$2 sm:$0xff]  ;;  %v1292_v24 = vld [vmem:[#allocation2 + $0x91] ss:$2 sm:$0xff]  ;;  %v1351_v22 = vsel %vm476_vm1, %v1348_v15, %v1350_v1  ;;  %v1430_v57 = vsel %vm636_vm0, %v1427_v0, %v1429_v49 }
 0x192   : > { %1232 = vst.msk [vmem:[#allocation2 + $0xb8] sm:$0xff] %vm1208_vm5, %v1199_v16  ;;  %v1197_v13 = vmax.f32 %v1165_v63, 0.0  ;;  %v1170_v47 = vadd.f32 %v3327_v7, %v1131_v21  ;;  %v1129_v30 = vmul.f32 %v3322_v27, %v1067_v28  ;;  %v2647_v45 = vpack.i.bf16 %v1428_v23, %v1426_v26 }
 0x193   : > { %2643 = vrot.lane.b32.xlu0 %v2642_v29, %s2819_s28  ;;  %v2365_v37 = vpop.f32.mrf.mxu0  ;;  %v1258_v31 = vld [vmem:[#allocation2 + $0x80] ss:$2 sm:$0xff]  ;;  %v1290_v32 = vld [vmem:[#allocation2 + $0x81] ss:$2 sm:$0xff]  ;;  %v3480_v48 = vmax.f32 %v1260_v53, %v1292_v24 }
 0x194   : > { %1230 = vst.msk [vmem:[#allocation2 + $0xa8] sm:$0xff] %vm1208_vm5, %v1197_v13  ;;  %v1202_v12 = vmax.f32 %v1170_v47, 0.0  ;;  %v1168_v50 = vadd.f32 %v3327_v7, %v1129_v30  ;;  %v1132_v35 = vmul.f32 %v2365_v37, %v3322_v27  ;;  %v3465_v33 = vmax.f32 %v1258_v31, %v1290_v32 }
 0x195   : > { %v1070_v38 = vpop.f32.mrf.mxu0  ;;  %v1354_v18 = vrot.slane %v3480_v48, 1  ;;  %v1433_v19 = vrot.slane %v3480_v48, 2 }
 0x196   : > { %1235 = vst.msk [vmem:[#allocation2 + $0xd0] sm:$0xff] %vm1208_vm5, %v1202_v12  ;;  %v1200_v40 = vmax.f32 %v1168_v50, 0.0  ;;  %v1171_v46 = vadd.f32 %v3327_v7, %v1132_v35  ;;  %v1130_v51 = vmul.f32 %v3322_v27, %v1070_v38  ;;  %v1352_v34 = vrot.slane %v3465_v33, 1 }
 0x197   : > { %2648 = vrot.lane.b32.xlu0 %v2647_v45, %s3856_s29  ;;  %v2368_v43 = vpop.f32.mrf.mxu0  ;;  %v1431_v42 = vrot.slane %v3465_v33, 2 }
 0x198   : > { %1233 = vst.msk [vmem:[#allocation2 + $0xc0] sm:$0xff] %vm1208_vm5, %v1200_v40  ;;  %v1203_v36 = vmax.f32 %v1171_v46, 0.0  ;;  %v1169_v39 = vadd.f32 %v3327_v7, %v1130_v51  ;;  %v1135_v55 = vmul.f32 %v2368_v43, %v3322_v27  ;;  %v1353_v56 = vsel %vm476_vm1, %v1350_v1, %v1352_v34 }
 0x199   : > { %v1083_v9 = vpop.f32.mrf.mxu0  ;;  %v2652_v25 = vpack.i.bf16 %v1353_v56, %v1351_v22  ;;  %v1432_v11 = vsel %vm636_vm0, %v1429_v49, %v1431_v42  ;;  %v1264_v29 = vld [vmem:[#allocation2 + $0xb0] ss:$2 sm:$0xff]  ;;  %v1296_v13 = vld [vmem:[#allocation2 + $0xb1] ss:$2 sm:$0xff]  ;;  %v1355_v23 = vsel %vm476_vm1, %v1352_v34, %v1354_v18 }
 0x19a   : > { %1236 = vst.msk [vmem:[#allocation2 + $0xd8] sm:$0xff] %vm1208_vm5, %v1203_v36  ;;  %v1201_v59 = vmax.f32 %v1169_v39, 0.0  ;;  %v1174_v60 = vadd.f32 %v3327_v7, %v1135_v55  ;;  %v1133_v3 = vmul.f32 %v3322_v27, %v1083_v9  ;;  %v2657_v17 = vpack.i.bf16 %v1432_v11, %v1430_v57 }
 0x19b   : > { %2653 = vrot.lane.b32.xlu1 %v2652_v25, %s2819_s28  ;;  %v2369_v62 = vpop.f32.mrf.mxu0  ;;  %v1262_v8 = vld [vmem:[#allocation2 + $0xa0] ss:$2 sm:$0xff]  ;;  %v1294_v4 = vld [vmem:[#allocation2 + $0xa1] ss:$2 sm:$0xff]  ;;  %v3507_v32 = vmax.f32 %v1264_v29, %v1296_v13 }
 0x19c   : > { %1234 = vst.msk [vmem:[#allocation2 + $0xc8] sm:$0xff] %vm1208_vm5, %v1201_v59  ;;  %v1206_v6 = vmax.f32 %v1174_v60, 0.0  ;;  %v1172_v15 = vadd.f32 %v3327_v7, %v1133_v3  ;;  %v1136_v5 = vmul.f32 %v2369_v62, %v3322_v27  ;;  %v3491_v41 = vmax.f32 %v1262_v8, %v1294_v4 }
 0x19d   : > { %v1086_v14 = vpop.f32.mrf.mxu0  ;;  %v1358_v45 = vrot.slane %v3507_v32, 1  ;;  %v1437_v24 = vrot.slane %v3507_v32, 2 }
 0x19e   : > { %1239 = vst.msk [vmem:[#allocation2 + $0xf0] sm:$0xff] %vm1208_vm5, %v1206_v6  ;;  %v1204_v16 = vmax.f32 %v1172_v15, 0.0  ;;  %v1175_v0 = vadd.f32 %v3327_v7, %v1136_v5  ;;  %v1134_v63 = vmul.f32 %v3322_v27, %v1086_v14  ;;  %v1356_v21 = vrot.slane %v3491_v41, 1 }
 0x19f   : > { %2658 = vrot.lane.b32.xlu1 %v2657_v17, %s3856_s29  ;;  %v1435_v28 = vrot.slane %v3491_v41, 2 }
 0x1a0   : > { %1237 = vst.msk [vmem:[#allocation2 + $0xe0] sm:$0xff] %vm1208_vm5, %v1204_v16  ;;  %v1207_v47 = vmax.f32 %v1175_v0, 0.0  ;;  %v1173_v30 = vadd.f32 %v3327_v7, %v1134_v63  ;;  %v1357_v37 = vsel %vm476_vm1, %v1354_v18, %v1356_v21  ;;  %v1434_v7 = vsel %vm636_vm0, %v1431_v42, %v1433_v19 }
 0x1a1   : > { %v2662_v27 = vpack.i.bf16 %v1357_v37, %v1355_v23  ;;  %v1436_v31 = vsel %vm636_vm0, %v1433_v19, %v1435_v28  ;;  %v1268_v46 = vld [vmem:[#allocation2 + $0xd0] ss:$2 sm:$0xff]  ;;  %v1300_v51 = vld [vmem:[#allocation2 + $0xd1] ss:$2 sm:$0xff]  ;;  %v1359_v34 = vsel %vm476_vm1, %v1356_v21, %v1358_v45  ;;  %v1438_v9 = vsel %vm636_vm0, %v1435_v28, %v1437_v24 }
 0x1a2   : > { %1241 = vst.msk [vmem:[#allocation2 + $0xf8] sm:$0x3f] %vm1240_vm6, %v1207_v47  ;;  %v1205_v26 = vmax.f32 %v1173_v30, 0.0  ;;  %v2667_v38 = vpack.i.bf16 %v1436_v31, %v1434_v7  ;;  %v3524_v39 = vmax.f32 %v1268_v46, %v1300_v51 }
 0x1a3   : > { %2663 = vrot.lane.b32.xlu0 %v2662_v27, %s2819_s28  ;;  %v1266_v12 = vld [vmem:[#allocation2 + $0xc0] ss:$2 sm:$0xff]  ;;  %v1298_v50 = vld [vmem:[#allocation2 + $0xc1] ss:$2 sm:$0xff] }
 0x1a4   : > { %1238 = vst.msk [vmem:[#allocation2 + $0xe8] sm:$0xff] %vm1208_vm5, %v1205_v26  ;;  %v3512_v35 = vmax.f32 %v1266_v12, %v1298_v50  ;;  %v1362_v11 = vrot.slane %v3524_v39, 1  ;;  %v1441_v57 = vrot.slane %v3524_v39, 2 }
 0x1a6   : > { %v1360_v1 = vrot.slane %v3512_v35, 1  ;;  %v1439_v40 = vrot.slane %v3512_v35, 2 }
 0x1a7   : > { %2668 = vrot.lane.b32.xlu0 %v2667_v38, %s3856_s29 }
 0x1a8   : > { %v1361_v53 = vsel %vm476_vm1, %v1358_v45, %v1360_v1  ;;  %v1440_v42 = vsel %vm636_vm0, %v1437_v24, %v1439_v40  ;;  %v1363_v4 = vsel %vm476_vm1, %v1360_v1, %v1362_v11  ;;  %v1442_v16 = vsel %vm636_vm0, %v1439_v40, %v1441_v57 }
 0x1a9   : > { %v2672_v43 = vpack.i.bf16 %v1361_v53, %v1359_v34  ;;  %v1272_v22 = vld [vmem:[#allocation2 + $0xf0] ss:$2 sm:$0x7f]  ;;  %v1304_v49 = vld [vmem:[#allocation2 + $0xf1] ss:$2 sm:$0x7f]  ;;  %v2677_v59 = vpack.i.bf16 %v1440_v42, %v1438_v9 }
 0x1aa   : > { %v3522_v36 = vmax.f32 %v1272_v22, %v1304_v49 }
 0x1ab   : > { %2673 = vrot.lane.b32.xlu1 %v2672_v43, %s2819_s28  ;;  %v1270_v55 = vld [vmem:[#allocation2 + $0xe0] ss:$2 sm:$0xff]  ;;  %v1302_v56 = vld [vmem:[#allocation2 + $0xe1] ss:$2 sm:$0xff] }
 0x1ac   : > { %v3528_v25 = vmax.f32 %v1270_v55, %v1302_v56  ;;  %v1366_v3 = vrot.slane %v3522_v36, 1  ;;  %v1445_v15 = vrot.slane %v3522_v36, 2 }
 0x1ae   : > { %v1364_v60 = vrot.slane %v3528_v25, 1  ;;  %v1443_v62 = vrot.slane %v3528_v25, 2 }
 0x1af   : > { %2678 = vrot.lane.b32.xlu1 %v2677_v59, %s3856_s29 }
 0x1b0   : > { %v1367_v8 = vsel %vm476_vm1, %v1364_v60, %v1366_v3  ;;  %v1365_v6 = vsel %vm476_vm1, %v1362_v11, %v1364_v60  ;;  %v1446_v17 = vsel %vm636_vm0, %v1443_v62, %v1445_v15  ;;  %v1444_v18 = vsel %vm636_vm0, %v1441_v57, %v1443_v62 }
 0x1b1   : > { %v2687_v5 = vpack.i.bf16 %v1366_v3, %v1367_v8  ;;  %v2682_v14 = vpack.i.bf16 %v1365_v6, %v1363_v4  ;;  %v2697_v0 = vpack.i.bf16 %v1445_v15, %v1446_v17  ;;  %v2692_v63 = vpack.i.bf16 %v1444_v18, %v1442_v16 }
 0x1b3   : > { %2688 = vrot.lane.b32.xlu1 %v2687_v5, %s2819_s28  ;;  %2683 = vrot.lane.b32.xlu0 %v2682_v14, %s2819_s28 }
 0x1b7   : > { %2698 = vrot.lane.b32.xlu1 %v2697_v0, %s3856_s29  ;;  %2693 = vrot.lane.b32.xlu0 %v2692_v63, %s3856_s29 }
 0x1f5   : > { %v2624_v21 = vpop.permute.xlu0 %2623 }
 0x1f6   : > { %v2626_v19 = vunpack.i.h.bf16 %v2624_v21  ;;  %v2625_v28 = vunpack.i.l.bf16 %v2624_v21 }
 0x1f8   : > { %v1495_v30 = vsel %vm1208_vm5, %v3364_v2, %v2625_v28  ;;  %v1496_v23 = vsel %vm1208_vm5, %v3369_v52, %v2626_v19 }
 0x1f9   : > { %v2629_v29 = vpop.permute.xlu0 %2628 }
 0x1fa   : > { %v2631_v13 = vunpack.i.h.bf16 %v2629_v29  ;;  %v2630_v47 = vunpack.i.l.bf16 %v2629_v29 }
 0x1fc   : > { %v1512_v37 = vsel %vm1511_vm7, %v1495_v30, %v2630_v47  ;;  %v1513_v27 = vsel %vm1511_vm7, %v1496_v23, %v2631_v13 }
 0x1fd   : > { %v2634_v26 = vpop.permute.xlu1 %2633  ;;  %v1528_v31 = vpack.c.bf16 %v1513_v27, %v1512_v37 }
 0x1fe   : > { %v2636_v12 = vunpack.i.h.bf16 %v2634_v26  ;;  %v2635_v50 = vunpack.i.l.bf16 %v2634_v26 }
 0x1ff   : > { %2382 = vmatprep.mubr.msk.bf16.mxu1 %vm1584_vm8, %v1528_v31 }
 0x200   : > { %v1498_v2 = vsel %vm1208_vm5, %v3399_v20, %v2636_v12  ;;  %v1497_v52 = vsel %vm1208_vm5, %v3381_v58, %v2635_v50 }
 0x201   : > { %v2639_v7 = vpop.permute.xlu1 %2638 }
 0x202   : > { %v2641_v38 = vunpack.i.h.bf16 %v2639_v7  ;;  %v2640_v45 = vunpack.i.l.bf16 %v2639_v7 }
 0x204   : > { %v1514_v1 = vsel %vm1511_vm7, %v1497_v52, %v2640_v45  ;;  %v1515_v40 = vsel %vm1511_vm7, %v1498_v2, %v2641_v38 }
 0x205   : > { %v1529_v46 = vpack.c.bf16 %v1515_v40, %v1514_v1  ;;  %v2644_v51 = vpop.permute.xlu0 %2643 }
 0x206   : > { %v2646_v34 = vunpack.i.h.bf16 %v2644_v51  ;;  %v2645_v53 = vunpack.i.l.bf16 %v2644_v51 }
 0x207   : > { %2383 = vmatmul.mubr.msk.bf16.vlgmr.msra.gmra.mxu1 %vm1584_vm8, %v1529_v46 }
 0x208   : > { %v1500_v49 = vsel %vm1208_vm5, %v3428_v54, %v2646_v34  ;;  %v1499_v20 = vsel %vm1208_vm5, %v3413_v10, %v2645_v53 }
 0x209   : > { %v2649_v24 = vpop.permute.xlu0 %2648 }
 0x20a   : > { %v2651_v43 = vunpack.i.h.bf16 %v2649_v24  ;;  %v2650_v22 = vunpack.i.l.bf16 %v2649_v24 }
 0x20c   : > { %v1516_v58 = vsel %vm1511_vm7, %v1499_v20, %v2650_v22  ;;  %v1517_v42 = vsel %vm1511_vm7, %v1500_v49, %v2651_v43  ;;  %v3617_v49 = vld [vmem:[%s3849_s6] ss:$0 sm:$0xff] }
 0x20d   : > { %v1530_v55 = vpack.c.bf16 %v1517_v42, %v1516_v58  ;;  %v2654_v56 = vpop.permute.xlu1 %2653 }
 0x20e   : > { %v2656_v9 = vunpack.i.h.bf16 %v2654_v56  ;;  %v2655_v59 = vunpack.i.l.bf16 %v2654_v56 }
 0x20f   : > { %2386 = vmatprep.mubr.msk.bf16.mxu1 %vm1584_vm8, %v1530_v55 }
 0x210   : > { %v1502_v62 = vsel %vm1208_vm5, %v3454_v44, %v2656_v9  ;;  %v1501_v54 = vsel %vm1208_vm5, %v3439_v61, %v2655_v59 }
 0x211   : > { %v2659_v60 = vpop.permute.xlu1 %2658 }
 0x212   : > { %v2661_v3 = vunpack.i.h.bf16 %v2659_v60  ;;  %v2660_v11 = vunpack.i.l.bf16 %v2659_v60 }
 0x214   : > { %v1518_v10 = vsel %vm1511_vm7, %v1501_v54, %v2660_v11  ;;  %v1519_v57 = vsel %vm1511_vm7, %v1502_v62, %v2661_v3 }
 0x215   : > { %v1531_v8 = vpack.c.bf16 %v1519_v57, %v1518_v10  ;;  %v2664_v4 = vpop.permute.xlu0 %2663 }
 0x216   : > { %v2666_v6 = vunpack.i.h.bf16 %v2664_v4  ;;  %v2665_v15 = vunpack.i.l.bf16 %v2664_v4 }
 0x217   : > { %2387 = vmatmul.mubr.msk.bf16.gmra.mxu1 %vm1584_vm8, %v1531_v8 }
 0x218   : > { %v1504_v18 = vsel %vm1208_vm5, %v3480_v48, %v2666_v6  ;;  %v1503_v44 = vsel %vm1208_vm5, %v3465_v33, %v2665_v15 }
 0x219   : > { %v2669_v5 = vpop.permute.xlu0 %2668 }
 0x21a   : > { %v2671_v14 = vunpack.i.h.bf16 %v2669_v5  ;;  %v2670_v17 = vunpack.i.l.bf16 %v2669_v5 }
 0x21c   : > { %v1520_v61 = vsel %vm1511_vm7, %v1503_v44, %v2670_v17  ;;  %v1521_v16 = vsel %vm1511_vm7, %v1504_v18, %v2671_v14 }
 0x21d   : > { %v1532_v0 = vpack.c.bf16 %v1521_v16, %v1520_v61  ;;  %v2674_v63 = vpop.permute.xlu1 %2673 }
 0x21e   : > { %v2676_v21 = vunpack.i.h.bf16 %v2674_v63  ;;  %v2675_v19 = vunpack.i.l.bf16 %v2674_v63 }
 0x21f   : > { %2390 = vmatprep.mubr.msk.bf16.mxu1 %vm1584_vm8, %v1532_v0 }
 0x220   : > { %v1506_v47 = vsel %vm1208_vm5, %v3507_v32, %v2676_v21  ;;  %v1505_v48 = vsel %vm1208_vm5, %v3491_v41, %v2675_v19 }
 0x221   : > { %v2679_v28 = vpop.permute.xlu1 %2678 }
 0x222   : > { %v2681_v29 = vunpack.i.h.bf16 %v2679_v28  ;;  %v2680_v13 = vunpack.i.l.bf16 %v2679_v28 }
 0x224   : > { %v1522_v33 = vsel %vm1511_vm7, %v1505_v48, %v2680_v13  ;;  %v1523_v30 = vsel %vm1511_vm7, %v1506_v47, %v2681_v29 }
 0x225   : > { %v1533_v23 = vpack.c.bf16 %v1523_v30, %v1522_v33  ;;  %v2689_v37 = vpop.permute.xlu1 %2688  ;;  %v2684_v27 = vpop.permute.xlu0 %2683 }
 0x226   : > { %v2691_v26 = vunpack.i.h.bf16 %v2689_v37  ;;  %v2690_v31 = vunpack.i.l.bf16 %v2689_v37  ;;  %v2686_v12 = vunpack.i.h.bf16 %v2684_v27  ;;  %v2685_v50 = vunpack.i.l.bf16 %v2684_v27  ;;  %v2751_v27 = vld [vmem:[%s3850_s7 + $0x18] sm:$0xff]  }
 0x227   : > { %2391 = vmatmul.mubr.msk.bf16.gmra.mxu1 %vm1584_vm8, %v1533_v23 }
 0x228   : > { %v1510_v41 = vsel %vm1208_vm5, %v3522_v36, %v2691_v26  ;;  %v1509_v1 = vsel %vm1208_vm5, %v3528_v25, %v2690_v31  ;;  %v1508_v40 = vsel %vm1208_vm5, %v3524_v39, %v2686_v12  ;;  %v1507_v46 = vsel %vm1208_vm5, %v3512_v35, %v2685_v50  ;;  %v2749_v36 = vld [vmem:[%s3850_s7 + $0x28] sm:$0xff]   ;;  %v2750_v35 = vld [vmem:[%s3850_s7 + $0x20] sm:$0xff]  }
 0x229   : > { %v2699_v7 = vpop.permute.xlu1 %2698  ;;  %v2694_v38 = vpop.permute.xlu0 %2693  ;;  %2398 = vmatprep.subr.bf16.mxu1 %v2749_v36  ;;  %v3612_v39 = vld [vmem:[%s3848_s5] ss:$0 sm:$0xff] }
 0x22a   : > { %v2701_v45 = vunpack.i.h.bf16 %v2699_v7  ;;  %v2700_v32 = vunpack.i.l.bf16 %v2699_v7  ;;  %v2696_v2 = vunpack.i.h.bf16 %v2694_v38  ;;  %v2695_v52 = vunpack.i.l.bf16 %v2694_v38  ;;  %2399 = vmatpush3.bf16.msra.mxu1 %v2749_v36 }
 0x22b   : > { %2400 = vmatprep.subr.bf16.mxu1 %v2750_v35 }
 0x22c   : > { %v1526_v51 = vsel %vm1511_vm7, %v1509_v1, %v2700_v32  ;;  %v1527_v34 = vsel %vm1511_vm7, %v1510_v41, %v2701_v45  ;;  %v1524_v53 = vsel %vm1511_vm7, %v1507_v46, %v2695_v52  ;;  %v1525_v24 = vsel %vm1511_vm7, %v1508_v40, %v2696_v2 }
 0x22d   : > { %v1535_v43 = vpack.c.bf16 %v1527_v34, %v1526_v51  ;;  %v1534_v22 = vpack.c.bf16 %v1525_v24, %v1524_v53  ;;  %v2752_v51 = vld [vmem:[%s3850_s7 + $0x10] sm:$0xff]  }
 0x22e   : > { %2401 = vmatpush3.bf16.msra.mxu1 %v2750_v35 }
 0x22f   : > { %2394 = vmatprep.mubr.msk.bf16.mxu1 %vm1584_vm8, %v1534_v22  ;;  %2402 = vmatprep.subr.bf16.mxu1 %v2751_v27 }
 0x230   : > { %2395 = vmatmul.mubr.msk.bf16.gmra.mxu1 %vm1584_vm8, %v1535_v43 }
 0x232   : > { %2403 = vmatpush3.bf16.msra.mxu1 %v2751_v27 }
 0x233   : > { %2404 = vmatprep.subr.bf16.mxu1 %v2752_v51 }
 0x236   : > { %2405 = vmatpush3.bf16.msra.mxu1 %v2752_v51 }
 0x2c7   : > { %v2384_v25 = vpop.f32.mrf.mxu1 }
 0x2c8   : > { %v1715_v20 = vmul.f32 %v2384_v25, %v3612_v39  ;;  %v2753_v25 = vld [vmem:[%s3850_s7 + $0x8] sm:$0xff]  }
 0x2c9   : > { %v1643_v58 = vpop.f32.mrf.mxu1  ;;  %2406 = vmatprep.subr.bf16.mxu1 %v2753_v25 }
 0x2ca   : > { %v1738_v42 = vadd.f32 %v3617_v49, %v1715_v20  ;;  %v1713_v55 = vmul.f32 %v3612_v39, %v1643_v58  ;;  %2407 = vmatpush3.bf16.msra.mxu1 %v2753_v25 }
 0x2cb   : > { %v2385_v56 = vpop.f32.mrf.mxu1 }
 0x2cc   : > { %v1754_v9 = vmax.f32 %v1738_v42, 0.0  ;;  %v1736_v59 = vadd.f32 %v3617_v49, %v1713_v55  ;;  %v1716_v60 = vmul.f32 %v2385_v56, %v3612_v39 }
 0x2cd   : > { %v1646_v3 = vpop.f32.mrf.mxu1 }
 0x2ce   : > { %1770 = vst.msk [vmem:[#allocation2 + $0x10] sm:$0xff] %vm1208_vm5, %v1754_v9  ;;  %v1752_v11 = vmax.f32 %v1736_v59, 0.0  ;;  %v1739_v62 = vadd.f32 %v3617_v49, %v1716_v60  ;;  %v1714_v54 = vmul.f32 %v3612_v39, %v1646_v3 }
 0x2d0   : > { %1768 = vst.msk [vmem:[#allocation2] sm:$0xff] %vm1208_vm5, %v1752_v11  ;;  %v1755_v10 = vmax.f32 %v1739_v62, 0.0  ;;  %v1737_v57 = vadd.f32 %v3617_v49, %v1714_v54 }
 0x2d2   : > { %1771 = vst.msk [vmem:[#allocation2 + $0x18] sm:$0xff] %vm1208_vm5, %v1755_v10  ;;  %v1753_v8 = vmax.f32 %v1737_v57, 0.0 }
 0x2d4   : > { %1769 = vst.msk [vmem:[#allocation2 + $0x8] sm:$0xff] %vm1208_vm5, %v1753_v8 }
 0x2d7   : > { %v2388_v4 = vpop.f32.mrf.mxu1 }
 0x2d8   : > { %v1719_v6 = vmul.f32 %v2388_v4, %v3612_v39 }
 0x2d9   : > { %v1659_v15 = vpop.f32.mrf.mxu1  ;;  %v1786_v48 = vld [vmem:[#allocation2 + $0x10] ss:$2 sm:$0xff]  ;;  %v1794_v33 = vld [vmem:[#allocation2 + $0x11] ss:$2 sm:$0xff] }
 0x2da   : > { %v1742_v5 = vadd.f32 %v3617_v49, %v1719_v6  ;;  %v1717_v14 = vmul.f32 %v3612_v39, %v1659_v15  ;;  %v3649_v31 = vmax.f32 %v1786_v48, %v1794_v33 }
 0x2db   : > { %v2389_v17 = vpop.f32.mrf.mxu1  ;;  %v1785_v13 = vld [vmem:[#allocation2] ss:$2 sm:$0xff]  ;;  %v1793_v47 = vld [vmem:[#allocation2 + $0x1] ss:$2 sm:$0xff] }
 0x2dc   : > { %v1758_v18 = vmax.f32 %v1742_v5, 0.0  ;;  %v1740_v44 = vadd.f32 %v3617_v49, %v1717_v14  ;;  %v1720_v61 = vmul.f32 %v2389_v17, %v3612_v39  ;;  %v3643_v23 = vmax.f32 %v1785_v13, %v1793_v47 }
 0x2dd   : > { %v1662_v16 = vpop.f32.mrf.mxu1  ;;  %v1818_v46 = vrot.slane %v3649_v31, 1  ;;  %v1857_v36 = vrot.slane %v3649_v31, 2 }
 0x2de   : > { %1774 = vst.msk [vmem:[#allocation2 + $0x30] sm:$0xff] %vm1208_vm5, %v1758_v18  ;;  %v1756_v0 = vmax.f32 %v1740_v44, 0.0  ;;  %v1743_v63 = vadd.f32 %v3617_v49, %v1720_v61  ;;  %v1718_v21 = vmul.f32 %v3612_v39, %v1662_v16  ;;  %v1817_v32 = vrot.slane %v3643_v23, 1  ;;  %v2754_v16 = vld [vmem:[%s3850_s7] sm:$0xff]  }
 0x2df   : > { %v1856_v22 = vrot.slane %v3643_v23, 2  ;;  %2408 = vmatprep.subr.bf16.mxu1 %v2754_v16 }
 0x2e0   : > { %1772 = vst.msk [vmem:[#allocation2 + $0x20] sm:$0xff] %vm1208_vm5, %v1756_v0  ;;  %v1759_v19 = vmax.f32 %v1743_v63, 0.0  ;;  %v1741_v28 = vadd.f32 %v3617_v49, %v1718_v21  ;;  %v1819_v55 = vsel %vm476_vm1, %v1817_v32, %v1818_v46  ;;  %2409 = vmatpush3.bf16.msra.mxu1 %v2754_v16 }
 0x2e1   : > { %v1858_v57 = vsel %vm636_vm0, %v1856_v22, %v1857_v36 }
 0x2e2   : > { %1775 = vst.msk [vmem:[#allocation2 + $0x38] sm:$0xff] %vm1208_vm5, %v1759_v19  ;;  %v1757_v29 = vmax.f32 %v1741_v28, 0.0 }
 0x2e4   : > { %1773 = vst.msk [vmem:[#allocation2 + $0x28] sm:$0xff] %vm1208_vm5, %v1757_v29 }
 0x2e7   : > { %v2392_v30 = vpop.f32.mrf.mxu1 }
 0x2e8   : > { %v1723_v37 = vmul.f32 %v2392_v30, %v3612_v39 }
 0x2e9   : > { %v1675_v26 = vpop.f32.mrf.mxu1  ;;  %v1788_v44 = vld [vmem:[#allocation2 + $0x30] ss:$2 sm:$0xff]  ;;  %v1796_v61 = vld [vmem:[#allocation2 + $0x31] ss:$2 sm:$0xff] }
 0x2ea   : > { %v1746_v12 = vadd.f32 %v3617_v49, %v1723_v37  ;;  %v1721_v50 = vmul.f32 %v3612_v39, %v1675_v26  ;;  %v3697_v21 = vmax.f32 %v1788_v44, %v1796_v61 }
 0x2eb   : > { %v2393_v7 = vpop.f32.mrf.mxu1  ;;  %v1787_v38 = vld [vmem:[#allocation2 + $0x20] ss:$2 sm:$0xff]  ;;  %v1795_v45 = vld [vmem:[#allocation2 + $0x21] ss:$2 sm:$0xff] }
 0x2ec   : > { %v1762_v2 = vmax.f32 %v1746_v12, 0.0  ;;  %v1744_v52 = vadd.f32 %v3617_v49, %v1721_v50  ;;  %v1724_v41 = vmul.f32 %v2393_v7, %v3612_v39  ;;  %v3656_v1 = vmax.f32 %v1787_v38, %v1795_v45 }
 0x2ed   : > { %v1678_v40 = vpop.f32.mrf.mxu1  ;;  %v1822_v13 = vrot.slane %v3697_v21, 1  ;;  %v1861_v30 = vrot.slane %v3697_v21, 2 }
 0x2ee   : > { %1778 = vst.msk [vmem:[#allocation2 + $0x50] sm:$0xff] %vm1208_vm5, %v1762_v2  ;;  %v1760_v34 = vmax.f32 %v1744_v52, 0.0  ;;  %v1747_v53 = vadd.f32 %v3617_v49, %v1724_v41  ;;  %v1722_v24 = vmul.f32 %v3612_v39, %v1678_v40  ;;  %v1820_v43 = vrot.slane %v3656_v1, 1 }
 0x2ef   : > { %v1859_v35 = vrot.slane %v3656_v1, 2 }
 0x2f0   : > { %1776 = vst.msk [vmem:[#allocation2 + $0x40] sm:$0xff] %vm1208_vm5, %v1760_v34  ;;  %v1763_v20 = vmax.f32 %v1747_v53, 0.0  ;;  %v1745_v58 = vadd.f32 %v3617_v49, %v1722_v24  ;;  %v2396_v42 = vpop.f32.mrf.mxu1  ;;  %v1821_v56 = vsel %vm476_vm1, %v1818_v46, %v1820_v43 }
 0x2f1   : > { %v1727_v9 = vmul.f32 %v2396_v42, %v3612_v39  ;;  %v2702_v59 = vpack.i.bf16 %v1821_v56, %v1819_v55  ;;  %v1860_v11 = vsel %vm636_vm0, %v1857_v36, %v1859_v35  ;;  %v1862_v32 = vsel %vm636_vm0, %v1859_v35, %v1861_v30 }
 0x2f2   : > { %1779 = vst.msk [vmem:[#allocation2 + $0x58] sm:$0xff] %vm1208_vm5, %v1763_v20  ;;  %v1761_v60 = vmax.f32 %v1745_v58, 0.0  ;;  %v1691_v3 = vpop.f32.mrf.mxu1  ;;  %v2707_v15 = vpack.i.bf16 %v1860_v11, %v1858_v57 }
 0x2f3   : > { %v1750_v62 = vadd.f32 %v3617_v49, %v1727_v9  ;;  %v1725_v54 = vmul.f32 %v3612_v39, %v1691_v3  ;;  %2703 = vrot.lane.b32.xlu0 %v2702_v59, %s2819_s28 }
 0x2f4   : > { %1777 = vst.msk [vmem:[#allocation2 + $0x48] sm:$0xff] %vm1208_vm5, %v1761_v60  ;;  %v2397_v10 = vpop.f32.mrf.mxu1 }
 0x2f5   : > { %v1766_v8 = vmax.f32 %v1750_v62, 0.0  ;;  %v1748_v4 = vadd.f32 %v3617_v49, %v1725_v54  ;;  %v1728_v6 = vmul.f32 %v2397_v10, %v3612_v39 }
 0x2f6   : > { %v1694_v5 = vpop.f32.mrf.mxu1 }
 0x2f7   : > { %1782 = vst.msk [vmem:[#allocation2 + $0x70] sm:$0xff] %vm1208_vm5, %v1766_v8  ;;  %v1764_v14 = vmax.f32 %v1748_v4, 0.0  ;;  %v1751_v17 = vadd.f32 %v3617_v49, %v1728_v6  ;;  %v1726_v18 = vmul.f32 %v3612_v39, %v1694_v5  ;;  %2708 = vrot.lane.b32.xlu0 %v2707_v15, %s3866_s20 }
 0x2f9   : > { %1780 = vst.msk [vmem:[#allocation2 + $0x60] sm:$0xff] %vm1208_vm5, %v1764_v14  ;;  %v1767_v0 = vmax.f32 %v1751_v17, 0.0  ;;  %v1749_v63 = vadd.f32 %v3617_v49, %v1726_v18  ;;  %v1823_v49 = vsel %vm476_vm1, %v1820_v43, %v1822_v13  ;;  %v1790_v37 = vld [vmem:[#allocation2 + $0x50] ss:$2 sm:$0xff]  ;;  %v1798_v27 = vld [vmem:[#allocation2 + $0x51] ss:$2 sm:$0xff] }
 0x2fa   : > { %v3712_v45 = vmax.f32 %v1790_v37, %v1798_v27 }
 0x2fb   : > { %1784 = vst.msk [vmem:[#allocation2 + $0x78] sm:$0x1f] %vm1783_vm9, %v1767_v0  ;;  %v1765_v19 = vmax.f32 %v1749_v63, 0.0  ;;  %v1789_v39 = vld [vmem:[#allocation2 + $0x40] ss:$2 sm:$0xff] }
 0x2fc   : > { %v1797_v28 = vld [vmem:[#allocation2 + $0x41] ss:$2 sm:$0xff]  ;;  %v1826_v34 = vrot.slane %v3712_v45, 1  ;;  %v1865_v24 = vrot.slane %v3712_v45, 2 }
 0x2fd   : > { %v3699_v29 = vmax.f32 %v1789_v39, %v1797_v28  ;;  %1781 = vst.msk [vmem:[#allocation2 + $0x68] sm:$0xff] %vm1208_vm5, %v1765_v19 }
 0x2ff   : > { %v1824_v47 = vrot.slane %v3699_v29, 1  ;;  %v1863_v48 = vrot.slane %v3699_v29, 2 }
 0x301   : > { %v1825_v33 = vsel %vm476_vm1, %v1822_v13, %v1824_v47  ;;  %v1864_v12 = vsel %vm636_vm0, %v1861_v30, %v1863_v48  ;;  %v1827_v22 = vsel %vm476_vm1, %v1824_v47, %v1826_v34  ;;  %v1866_v55 = vsel %vm636_vm0, %v1863_v48, %v1865_v24 }
 0x302   : > { %v2712_v26 = vpack.i.bf16 %v1825_v33, %v1823_v49  ;;  %v1792_v50 = vld [vmem:[#allocation2 + $0x70] ss:$2 sm:$0x3f]  ;;  %v1800_v7 = vld [vmem:[#allocation2 + $0x71] ss:$2 sm:$0x3f]  ;;  %v2717_v41 = vpack.i.bf16 %v1864_v12, %v1862_v32 }
 0x303   : > { %v3710_v38 = vmax.f32 %v1792_v50, %v1800_v7 }
 0x304   : > { %2713 = vrot.lane.b32.xlu1 %v2712_v26, %s2819_s28  ;;  %v1791_v2 = vld [vmem:[#allocation2 + $0x60] ss:$2 sm:$0xff]  ;;  %v1799_v52 = vld [vmem:[#allocation2 + $0x61] ss:$2 sm:$0xff] }
 0x305   : > { %v1807_v40 = vmax.f32 %v1791_v2, %v1799_v52  ;;  %v1830_v51 = vrot.slane %v3710_v38, 1  ;;  %v1869_v35 = vrot.slane %v3710_v38, 2 }
 0x307   : > { %v1828_v46 = vrot.slane %v1807_v40, 1  ;;  %v1867_v53 = vrot.slane %v1807_v40, 2 }
 0x308   : > { %2718 = vrot.lane.b32.xlu1 %v2717_v41, %s3866_s20 }
 0x309   : > { %v1831_v43 = vsel %vm476_vm1, %v1828_v46, %v1830_v51  ;;  %v1829_v36 = vsel %vm476_vm1, %v1826_v34, %v1828_v46  ;;  %v1870_v58 = vsel %vm636_vm0, %v1867_v53, %v1869_v35  ;;  %v1868_v42 = vsel %vm636_vm0, %v1865_v24, %v1867_v53 }
 0x30a   : > { %v2727_v25 = vpack.i.bf16 %v1830_v51, %v1831_v43  ;;  %v2722_v20 = vpack.i.bf16 %v1829_v36, %v1827_v22  ;;  %v2737_v56 = vpack.i.bf16 %v1869_v35, %v1870_v58  ;;  %v2732_v9 = vpack.i.bf16 %v1868_v42, %v1866_v55 }
 0x30c   : > { %2728 = vrot.lane.b32.xlu1 %v2727_v25, %s2819_s28  ;;  %2723 = vrot.lane.b32.xlu0 %v2722_v20, %s2819_s28 }
 0x310   : > { %2738 = vrot.lane.b32.xlu1 %v2737_v56, %s3866_s20  ;;  %2733 = vrot.lane.b32.xlu0 %v2732_v9, %s3866_s20  ;;  %s405_s20 = scalar_lea.vmem [#allocation3], %s404_s16 }
 0x311   : > { %s2179_s26 = sshll.u32 %s405_s20, 4  ;;  %s2180_s26 = int_to_ptr.vmem [resolvable:$true] %s2179_s26 }
 0x312   : > { %s2755_s1 = scalar_lea.vmem %s2180_s26, 16  ;;  %p2762_p0 = scmp.lt.s32.totalorder %s2180_s26, %s2760_s18 }
 0x313   : > { %p2756_p11 = scmp.ne.s32.totalorder %s2180_s26, %s2755_s1  ;;  %p2763_p1 = scmp.lt.s32.totalorder %s2761_s25, %s2755_s1 }
 0x315   : > { %p2757_p12 = pnand %p2756_p11, %p2925_p5  ;;  %p2764_p2 = por %p2763_p1, %p2762_p0 }
 0x317   : > { %p2758_p13 = pneg %p2757_p12 }
 0x319   : > { %p2765_p3 = pnand %p2764_p2, %p2758_p13 }
 0x365   : > { %v2704_v59 = vpop.permute.xlu0 %2703 }
 0x366   : > { %v2706_v60 = vunpack.i.h.bf16 %v2704_v59  ;;  %v2705_v3 = vunpack.i.l.bf16 %v2704_v59 }
 0x368   : > { %v1896_v10 = vsel %vm1208_vm5, %v3649_v31, %v2706_v60  ;;  %v1895_v57 = vsel %vm1208_vm5, %v3643_v23, %v2705_v3 }
 0x369   : > { %v2709_v11 = vpop.permute.xlu0 %2708 }
 0x36a   : > { %v2711_v62 = vunpack.i.h.bf16 %v2709_v11  ;;  %v2710_v54 = vunpack.i.l.bf16 %v2709_v11 }
 0x36c   : > { %v1903_v8 = vsel %vm1511_vm7, %v1895_v57, %v2710_v54  ;;  %v1904_v4 = vsel %vm1511_vm7, %v1896_v10, %v2711_v62 }
 0x36d   : > { %v1911_v6 = vpack.c.bf16 %v1904_v4, %v1903_v8 }
 0x36f   : > { %2410 = vmatprep.mubr.msk.bf16.mxu1 %vm1584_vm8, %v1911_v6 }
 0x376   : > { %v2714_v15 = vpop.permute.xlu1 %2713 }
 0x377   : > { %v2716_v5 = vunpack.i.h.bf16 %v2714_v15  ;;  %v2715_v14 = vunpack.i.l.bf16 %v2714_v15  ;;  %v2100_v15 = vld [vmem:[%s3853_s10 + $0x8] sm:$0xff] }
 0x379   : > { %v1898_v61 = vsel %vm1208_vm5, %v3697_v21, %v2716_v5  ;;  %v1897_v31 = vsel %vm1208_vm5, %v3656_v1, %v2715_v14 }
 0x37a   : > { %v2719_v17 = vpop.permute.xlu1 %2718 }
 0x37b   : > { %v2721_v18 = vunpack.i.h.bf16 %v2719_v17  ;;  %v2720_v44 = vunpack.i.l.bf16 %v2719_v17  ;;  %v2288_v17 = vld [vmem:[%s3853_s10 + $0x28] sm:$0xff] }
 0x37d   : > { %v1905_v23 = vsel %vm1511_vm7, %v1897_v31, %v2720_v44  ;;  %v1906_v16 = vsel %vm1511_vm7, %v1898_v61, %v2721_v18 }
 0x37e   : > { %v1912_v0 = vpack.c.bf16 %v1906_v16, %v1905_v23  ;;  %v2729_v63 = vpop.permute.xlu1 %2728  ;;  %v2724_v19 = vpop.permute.xlu0 %2723  ;;  %v2099_v16 = vld [vmem:[%s3853_s10] sm:$0xff] }
 0x37f   : > { %v2731_v39 = vunpack.i.h.bf16 %v2729_v63  ;;  %v2730_v28 = vunpack.i.l.bf16 %v2729_v63  ;;  %v2726_v13 = vunpack.i.h.bf16 %v2724_v19  ;;  %v2725_v47 = vunpack.i.l.bf16 %v2724_v19 }
 0x380   : > { %2411 = vmatmul.mubr.msk.bf16.vlgmr.msra.gmra.mxu1 %vm1584_vm8, %v1912_v0 }
 0x381   : > { %v1902_v1 = vsel %vm1208_vm5, %v3710_v38, %v2731_v39  ;;  %v1901_v27 = vsel %vm1208_vm5, %v1807_v40, %v2730_v28  ;;  %v1900_v26 = vsel %vm1208_vm5, %v3712_v45, %v2726_v13  ;;  %v1899_v12 = vsel %vm1208_vm5, %v3699_v29, %v2725_v47  ;;  %v2285_v38 = vld [vmem:[%s3851_s8] ss:$0 sm:$0xff] }
 0x382   : > { %v2739_v48 = vpop.permute.xlu1 %2738  ;;  %v2734_v49 = vpop.permute.xlu0 %2733  ;;  %v2286_v29 = vld [vmem:[%s3852_s9] ss:$0 sm:$0xff] }
 0x383   : > { %v2741_v33 = vunpack.i.h.bf16 %v2739_v48  ;;  %v2740_v21 = vunpack.i.l.bf16 %v2739_v48  ;;  %v2736_v30 = vunpack.i.h.bf16 %v2734_v49  ;;  %v2735_v37 = vunpack.i.l.bf16 %v2734_v49  ;;  %v2287_v48 = vld [vmem:[%s3853_s10 + $0x20] sm:$0xff] }
 0x385   : > { %v1909_v50 = vsel %vm1511_vm7, %v1901_v27, %v2740_v21  ;;  %v1910_v7 = vsel %vm1511_vm7, %v1902_v1, %v2741_v33  ;;  %v1907_v32 = vsel %vm1511_vm7, %v1899_v12, %v2735_v37  ;;  %v1908_v2 = vsel %vm1511_vm7, %v1900_v26, %v2736_v30  ;;  %v2289_v37 = vld [vmem:[%s3853_s10 + $0x30] sm:$0xff] }
 0x386   : > { %v1914_v52 = vpack.c.bf16 %v1910_v7, %v1909_v50  ;;  %v1913_v41 = vpack.c.bf16 %v1908_v2, %v1907_v32  ;;  %v2101_v26 = vld [vmem:[%s3853_s10 + $0x10] sm:$0xff]  ;;  %v2290_v32 = vld [vmem:[%s3853_s10 + $0x38] sm:$0x3f] }
 0x387   : > { %v2102_v2 = vld [vmem:[%s3853_s10 + $0x18] sm:$0x3f] }
 0x388   : > { %2414 = vmatprep.mubr.msk.bf16.mxu1 %vm1584_vm8, %v1913_v41 }
 0x389   : > { %2415 = vmatmul.mubr.msk.bf16.gmra.mxu1 %vm1584_vm8, %v1914_v52 }
 0x440   : > { %v2412_v45 = vpop.f32.mrf.mxu1 }
 0x441   : > { %v2049_v40 = vmul.f32 %v2412_v45, %v2285_v38 }
 0x442   : > { %v2009_v46 = vpop.f32.mrf.mxu1 }
 0x443   : > { %v2064_v51 = vadd.f32 %v2286_v29, %v2049_v40  ;;  %v2047_v34 = vmul.f32 %v2285_v38, %v2009_v46 }
 0x444   : > { %v2413_v53 = vpop.f32.mrf.mxu1 }
 0x445   : > { %v2072_v24 = vmax.f32 %v2064_v51, 0.0  ;;  %v2062_v43 = vadd.f32 %v2286_v29, %v2047_v34  ;;  %v2050_v22 = vmul.f32 %v2413_v53, %v2285_v38 }
 0x446   : > { %v2012_v36 = vpop.f32.mrf.mxu1 }
 0x447   : > { %2080 = vst.msk [vmem:[#allocation2 + $0x10] sm:$0xff] %vm1208_vm5, %v2072_v24  ;;  %v2070_v35 = vmax.f32 %v2062_v43, 0.0  ;;  %v2065_v25 = vadd.f32 %v2286_v29, %v2050_v22  ;;  %v2048_v20 = vmul.f32 %v2285_v38, %v2012_v36 }
 0x449   : > { %2078 = vst.msk [vmem:[#allocation2] sm:$0xff] %vm1208_vm5, %v2070_v35  ;;  %v2073_v58 = vmax.f32 %v2065_v25, 0.0  ;;  %v2063_v42 = vadd.f32 %v2286_v29, %v2048_v20  ;;  %v2416_v55 = vpop.f32.mrf.mxu1 }
 0x44a   : > { %v2053_v9 = vmul.f32 %v2416_v55, %v2285_v38 }
 0x44b   : > { %2081 = vst.msk [vmem:[#allocation2 + $0x18] sm:$0xff] %vm1208_vm5, %v2073_v58  ;;  %v2071_v56 = vmax.f32 %v2063_v42, 0.0  ;;  %v2025_v59 = vpop.f32.mrf.mxu1 }
 0x44c   : > { %v2068_v60 = vadd.f32 %v2286_v29, %v2053_v9  ;;  %v2051_v3 = vmul.f32 %v2285_v38, %v2025_v59 }
 0x44d   : > { %2079 = vst.msk [vmem:[#allocation2 + $0x8] sm:$0xff] %vm1208_vm5, %v2071_v56  ;;  %v2417_v11 = vpop.f32.mrf.mxu1 }
 0x44e   : > { %v2076_v62 = vmax.f32 %v2068_v60, 0.0  ;;  %v2066_v54 = vadd.f32 %v2286_v29, %v2051_v3  ;;  %v2054_v10 = vmul.f32 %v2417_v11, %v2285_v38 }
 0x44f   : > { %v2028_v57 = vpop.f32.mrf.mxu1 }
 0x450   : > { %2084 = vst.msk [vmem:[#allocation2 + $0x30] sm:$0xff] %vm1208_vm5, %v2076_v62  ;;  %v2074_v8 = vmax.f32 %v2066_v54, 0.0  ;;  %v2069_v4 = vadd.f32 %v2286_v29, %v2054_v10  ;;  %v2052_v6 = vmul.f32 %v2285_v38, %v2028_v57 }
 0x452   : > { %v2088_v5 = vld [vmem:[#allocation2 + $0x10] ss:$2 sm:$0xff]  ;;  %v2092_v14 = vld [vmem:[#allocation2 + $0x11] ss:$2 sm:$0xff]  ;;  %2082 = vst.msk [vmem:[#allocation2 + $0x20] sm:$0xff] %vm1208_vm5, %v2074_v8  ;;  %v2077_v18 = vmax.f32 %v2069_v4, 0.0  ;;  %v2067_v44 = vadd.f32 %v2286_v29, %v2052_v6 }
 0x453   : > { %v2096_v61 = vmax.f32 %v2088_v5, %v2092_v14 }
 0x454   : > { %v2087_v31 = vld [vmem:[#allocation2] ss:$2 sm:$0xff]  ;;  %v2091_v23 = vld [vmem:[#allocation2 + $0x1] ss:$2 sm:$0xff]  ;;  %2086 = vst.msk [vmem:[#allocation2 + $0x38] sm:$0xf] %vm2085_vm10, %v2077_v18 }
 0x455   : > { %v2075_v0 = vmax.f32 %v2067_v44, 0.0  ;;  %v2104_v63 = vmul.f32 %v2100_v15, %v2096_v61  ;;  %v2135_v19 = vmul.f32 %v2288_v17, %v2096_v61  ;;  %v2095_v39 = vmax.f32 %v2087_v31, %v2091_v23  ;;  %v2162_v17 = vld [vmem:[%s3854_s11] sm:$0x1] }
 0x457   : > { %2083 = vst.msk [vmem:[#allocation2 + $0x28] sm:$0xff] %vm1208_vm5, %v2075_v0  ;;  %v2110_v28 = vsel %vm1208_vm5, %v2104_v63, 0.0  ;;  %v2141_v13 = vsel %vm1208_vm5, %v2135_v19, 0.0  ;;  %v2103_v47 = vmul.f32 %v2099_v16, %v2095_v39  ;;  %v2134_v33 = vmul.f32 %v2287_v48, %v2095_v39 }
 0x458   : > { %2111 = vadd.xlane.f32.xlu1 %v2110_v28  ;;  %2142 = vadd.xlane.f32.xlu0 %v2141_v13 }
 0x459   : > { %v2107_v49 = vsel %vm1208_vm5, %v2103_v47, 0.0  ;;  %v2138_v12 = vsel %vm1208_vm5, %v2134_v33, 0.0 }
 0x45b   : > { %v2090_v21 = vld [vmem:[#allocation2 + $0x30] ss:$2 sm:$0x3f]  ;;  %v2094_v30 = vld [vmem:[#allocation2 + $0x31] ss:$2 sm:$0x3f] }
 0x45c   : > { %2108 = vadd.xlane.f32.xlu0 %v2107_v49  ;;  %v2098_v7 = vmax.f32 %v2090_v21, %v2094_v30 }
 0x45e   : > { %v2089_v1 = vld [vmem:[#allocation2 + $0x20] ss:$2 sm:$0xff]  ;;  %v2093_v27 = vld [vmem:[#allocation2 + $0x21] ss:$2 sm:$0xff]  ;;  %v2137_v29 = vmul.f32 %v2290_v32, %v2098_v7  ;;  %v2106_v40 = vmul.f32 %v2102_v2, %v2098_v7 }
 0x45f   : > { %v2097_v50 = vmax.f32 %v2089_v1, %v2093_v27 }
 0x460   : > { %2139 = vadd.xlane.f32.xlu0 %v2138_v12  ;;  %v2147_v46 = vsel %vm1240_vm6, %v2137_v29, 0.0  ;;  %v2116_v51 = vsel %vm1240_vm6, %v2106_v40, 0.0 }
 0x461   : > { %v2136_v52 = vmul.f32 %v2289_v37, %v2097_v50  ;;  %v2105_v41 = vmul.f32 %v2101_v26, %v2097_v50 }
 0x463   : > { %v2144_v38 = vsel %vm1208_vm5, %v2136_v52, 0.0  ;;  %v2113_v45 = vsel %vm1208_vm5, %v2105_v41, 0.0 }
 0x464   : > { %2145 = vadd.xlane.f32.xlu0 %v2144_v38  ;;  %2114 = vadd.xlane.f32.xlu1 %v2113_v45 }
 0x468   : > { %2148 = vadd.xlane.f32.xlu0 %v2147_v46  ;;  %2117 = vadd.xlane.f32.xlu1 %v2116_v51 }
 0x4e1   : > { %v2143_v34 = vpop.xlane.xlu0 %2142  ;;  %v2112_v24 = vpop.xlane.xlu1 %2111 }
 0x4e5   : > { %v2109_v53 = vpop.xlane.xlu0 %2108 }
 0x4e6   : > { %v2119_v35 = vadd.f32 %v2112_v24, %v2109_v53 }
 0x4e9   : > { %v2140_v43 = vpop.xlane.xlu0 %2139 }
 0x4ea   : > { %v2150_v25 = vadd.f32 %v2143_v34, %v2140_v43 }
 0x4ed   : > { %v2146_v22 = vpop.xlane.xlu0 %2145  ;;  %v2115_v36 = vpop.xlane.xlu1 %2114 }
 0x4ee   : > { %v2151_v20 = vadd.f32 %v2150_v25, %v2146_v22  ;;  %v2120_v58 = vadd.f32 %v2119_v35, %v2115_v36 }
 0x4f1   : > { %v2149_v42 = vpop.xlane.xlu0 %2148  ;;  %v2118_v55 = vpop.xlane.xlu1 %2117 }
 0x4f2   : > { %v2152_v56 = vsel %vm636_vm0, %v2149_v42, 0.0  ;;  %v2121_v9 = vsel %vm636_vm0, %v2118_v55, 0.0 }
 0x4f3   : > { %v2153_v59 = vadd.f32 %v2152_v56, %v2151_v20  ;;  %v2122_v60 = vadd.f32 %v2121_v9, %v2120_v58 }
 0x4f5   : > { %v2154_v3 = vrot.slane %v2153_v59, 4  ;;  %v2123_v11 = vrot.slane %v2122_v60, 4 }
 0x4f7   : > { %v2155_v62 = vadd.f32 %v2154_v3, %v2153_v59  ;;  %v2124_v54 = vadd.f32 %v2123_v11, %v2122_v60 }
 0x4f9   : > { %v2156_v10 = vrot.slane %v2155_v62, 2  ;;  %v2125_v57 = vrot.slane %v2124_v54, 2 }
 0x4fb   : > { %v2157_v8 = vadd.f32 %v2156_v10, %v2155_v62  ;;  %v2126_v4 = vadd.f32 %v2125_v57, %v2124_v54 }
 0x4fd   : > { %v2158_v6 = vrot.slane %v2157_v8, 1  ;;  %v2127_v15 = vrot.slane %v2126_v4, 1 }
 0x4ff   : > { %v2159_v5 = vadd.f32 %v2158_v6, %v2157_v8  ;;  %v2128_v14 = vadd.f32 %v2127_v15, %v2126_v4 }
 0x501   : > { %v2161_v18 = vsel %vm2160_vm11, %v2128_v14, %v2159_v5 }
 0x502   : > { %v2163_v44 = vadd.f32 %v2162_v17, %v2161_v18 }
 0x504   : > { %2165 = vst.msk [vmem:[%s405_s20] sm:$0x1] %vm2164_vm12, %v2163_v44 }
 0x505   : > { %2768 = shalt.err (!%p2765_p3)
}
 0x506   : > { %s2769_s2 = scalar_lea.hbm %s2177_s15, 16  ;;  %s2773_s20 = scalar_lea.hbm %s3855_s12, 32 }
 0x507   : > { %p2770_p4 = scmp.ne.s32.totalorder %s2177_s15, %s2769_s2  ;;  %p2774_p9 = scmp.lt.s32.totalorder %s2177_s15, %s3855_s12 }
 0x508   : > { %p2775_p10 = scmp.lt.s32.totalorder %s2773_s20, %s2769_s2 }
 0x509   : > { %p2771_p7 = pnand %p2770_p4, %p2925_p5 }
 0x50a   : > { %p2776_p11 = por %p2775_p10, %p2774_p9 }
 0x50b   : > { %p2772_p8 = pneg %p2771_p7 }
 0x50d   : > { %p2777_p12 = pnand %p2776_p11, %p2772_p8 }
 0x50f   : > { %2780 = shalt.err (!%p2777_p12)
}
 0x510   : > { %2419 = dma.vmem_to_hbm [thread:$0]  (%p2925_p5), %s2180_s26, 16, %s2177_s15, %s2167_s0  }
 0x511 PF: > { %p2425_p13 = scmp.ge.s32.totalorder %s2815_s24, 2  ;;  %s2191_s1 = sand.u32 1, %s2803_s21  }
 0x512   : > { %s2192_s17 = scalar_lea.sflag [#allocation4], %s2191_s1 }
 0x513   : > { %p2422_p0 = pnand %p2425_p13, %p2929_p6 }
 0x515   : > { %p2423_p1 = pneg %p2422_p0 }
 0x517   : > { %2798 = dma.done.wait (%p2423_p1), %s2192_s17, 16  }
 0x518   : > { %2800 = vsyncadd (%p2423_p1), %s2192_s17, 4294967280  ;;  %p22_p2 = scmp.ge.s32.totalorder %s2912_s27, 4   ;;  %s3867_s21 = smov %s2807_s22 }
 0x519   : > { %s3868_s22 = smov %s2811_s23  ;;  %s3869_s23 = smov %s2923_s30 }
 0x51a   : > { %s3870_s24 = smov %s2912_s27  ;;  %24 = sbr.rel (!%p22_p2) target bundleno = 7 (0x7), region = 135 }
 0x51f   :  { %2196 = vsyncpa [#allocation4], 1 }
 0x520   :  { %2198 = vsyncpa [#allocation4 + $0x1], 1 }

</bundles_post_ra>
